<compile_context>
chip_gen: v7x
topology: tpu7x:2x2x1
jax: 0.10.0
libtpu: 0.0.40
codegen_flags: <defaults>
</compile_context>

<pallas_src>
import functools

import jax
import jax.numpy as jnp
from jax.experimental import pallas as pl
from jax.experimental.pallas import tpu as pltpu

_LANE = 128
_SUBLANE = 8
_M_TILE_MAX = 1024                 # rows per tile; fits double-buffering in v7x 64 MiB VMEM
_VMEM_LIMIT = 48 * 1024 * 1024     # explicit scoped-VMEM budget, headroom below v7x physical


# -----------------------------------------------------------------------------
# Small helpers
# -----------------------------------------------------------------------------
def _round_up(x, m):
    return (x + m - 1) // m * m


def _choose_m_tile(m):
    m8 = _round_up(m, _SUBLANE)
    return m8 if m8 <= _M_TILE_MAX else _M_TILE_MAX


def _pad2d(x, rows, cols):
    r, c = x.shape
    return jnp.pad(x, ((0, rows - r), (0, cols - c)))


def _pad1d(v, n):
    return jnp.pad(v.astype(jnp.float32), (0, n - v.shape[0]))


def _im2col(x_nhwc, ksize, stride, pad):
    """(N,H,W,C) -> patches (N*Ho*Wo, ksize*ksize*C), Ho, Wo.  Pure slicing glue."""
    N, H, W, C = x_nhwc.shape
    Ho = (H + 2 * pad - ksize) // stride + 1
    Wo = (W + 2 * pad - ksize) // stride + 1
    if pad:
        x_nhwc = jnp.pad(x_nhwc, ((0, 0), (pad, pad), (pad, pad), (0, 0)))
    cols = []
    for kh in range(ksize):
        for kw in range(ksize):
            sl = x_nhwc[:, kh:kh + stride * Ho:stride, kw:kw + stride * Wo:stride, :]
            cols.append(sl.reshape(N * Ho * Wo, C))
    return jnp.concatenate(cols, axis=1), Ho, Wo


# -----------------------------------------------------------------------------
# Pallas kernels
# -----------------------------------------------------------------------------
def _conv_mm_kernel(p_ref, w_ref, o_ref, sum_ref, ssq_ref):
    """One MXU matmul per M-tile (tap axis folded into contraction), fp32 accumulation.

    Epilogue emits per-tile per-channel sum and sum-of-squares so the BN stage does
    not need a separate stats pass over the conv output in HBM.
    """
    acc = jnp.dot(p_ref[...], w_ref[...], preferred_element_type=jnp.float32)
    o_ref[...] = acc
    s = jnp.sum(acc, axis=0, keepdims=True)        # (1, Cpad)
    q = jnp.sum(acc * acc, axis=0, keepdims=True)  # (1, Cpad)
    sum_ref[...] = jnp.broadcast_to(s.reshape(1, 1, -1), sum_ref.shape)
    ssq_ref[...] = jnp.broadcast_to(q.reshape(1, 1, -1), ssq_ref.shape)


def _make_bn_apply_kernel(has_residual: bool, do_relu: bool):
    """y = x * scale + shift (+ residual) (ReLU).  All fp32 VPU work, lane-dense stores."""

    def kernel(x_ref, scale_ref, shift_ref, *rest):
        if has_residual:
            r_ref, o_ref = rest
        else:
            (o_ref,) = rest
        y = x_ref[...] * scale_ref[...] + shift_ref[...]
        if has_residual:
            y = y + r_ref[...]
        if do_relu:
            y = jnp.maximum(y, 0.0)
        o_ref[...] = y

    return kernel


# -----------------------------------------------------------------------------
# pallas_call wrappers
# -----------------------------------------------------------------------------
def _conv_matmul_pallas(patches_pad, w_pad, m_tile):
    """patches_pad: (M_pad, Kc) bf16; w_pad: (Kc, Cpad) bf16.
    Returns (out (M_pad, Cpad) f32, col_sum (Cpad,) f32, col_ssq (Cpad,) f32)."""
    m_pad, kc = patches_pad.shape
    _, c_pad = w_pad.shape
    t = m_pad // m_tile

    out, sums, ssq = pl.pallas_call(
        _conv_mm_kernel,
        out_shape=(
            jax.ShapeDtypeStruct((m_pad, c_pad), jnp.float32),
            jax.ShapeDtypeStruct((t, _SUBLANE, c_pad), jnp.float32),
            jax.ShapeDtypeStruct((t, _SUBLANE, c_pad), jnp.float32),
        ),
        grid_spec=pltpu.PrefetchScalarGridSpec(
            num_scalar_prefetch=0,
            grid=(t,),
            in_specs=[
                pl.BlockSpec((m_tile, kc), lambda i: (i, 0)),
                pl.BlockSpec((kc, c_pad), lambda i: (0, 0)),
            ],
            out_specs=(
                pl.BlockSpec((m_tile, c_pad), lambda i: (i, 0)),
                pl.BlockSpec((1, _SUBLANE, c_pad), lambda i: (i, 0, 0)),
                pl.BlockSpec((1, _SUBLANE, c_pad), lambda i: (i, 0, 0)),
            ),
        ),
        compiler_params=pltpu.CompilerParams(
            dimension_semantics=("parallel",),
            vmem_limit_bytes=_VMEM_LIMIT,
        ),
    )(patches_pad, w_pad)

    # Tiny per-tile stats reduction (T x Cpad) done in plain JAX.
    col_sum = jnp.sum(sums[:, 0, :], axis=0)
    col_ssq = jnp.sum(ssq[:, 0, :], axis=0)
    return out, col_sum, col_ssq


def _bn_apply_pallas(x_pad, scale, shift, m_tile, *, residual=None, relu=False):
    """Tiled normalize/affine (+ residual) (+ ReLU) over the (M_pad, Cpad) slab."""
    m_pad, c_pad = x_pad.shape
    t = m_pad // m_tile
    scale2 = scale.reshape(1, c_pad)
    shift2 = shift.reshape(1, c_pad)

    args = [x_pad, scale2, shift2]
    in_specs = [
        pl.BlockSpec((m_tile, c_pad), lambda i: (i, 0)),
        pl.BlockSpec((1, c_pad), lambda i: (0, 0)),
        pl.BlockSpec((1, c_pad), lambda i: (0, 0)),
    ]
    if residual is not None:
        assert residual.shape == x_pad.shape, "residual / main-path shape mismatch"
        args.append(residual)
        in_specs.append(pl.BlockSpec((m_tile, c_pad), lambda i: (i, 0)))

    kernel = _make_bn_apply_kernel(residual is not None, relu)
    return pl.pallas_call(
        kernel,
        out_shape=jax.ShapeDtypeStruct((m_pad, c_pad), jnp.float32),
        grid_spec=pltpu.PrefetchScalarGridSpec(
            num_scalar_prefetch=0,
            grid=(t,),
            in_specs=in_specs,
            out_specs=pl.BlockSpec((m_tile, c_pad), lambda i: (i, 0)),
        ),
        compiler_params=pltpu.CompilerParams(
            dimension_semantics=("parallel",),
            vmem_limit_bytes=_VMEM_LIMIT,
        ),
    )(*args)


def _bn_scale_shift(col_sum, col_ssq, gamma, beta, m, eps):
    """Per-channel scale/shift from fp32 sums (training-mode batch stats, biased var)."""
    mean = col_sum / m
    # E[x^2] - mean^2 in fp32 from fp32 accumulators; clamp guards tiny negative from
    # cancellation.  (A Welford pass would be needed only for extreme magnitudes.)
    var = jnp.maximum(col_ssq / m - mean * mean, 0.0)
    inv_std = jax.lax.rsqrt(var + eps)
    scale = gamma * inv_std
    shift = beta - mean * scale
    return scale, shift


# -----------------------------------------------------------------------------
# BasicBlock forward (NHWC)
# -----------------------------------------------------------------------------
@functools.partial(jax.jit, static_argnames=("stride",))
def basic_block_forward(x_nhwc, params, stride):
    eps = 1e-5
    N, H, W, Cin = x_nhwc.shape
    Cout = params["g1"].shape[0]
    has_ds = "wd" in params
    if not has_ds:
        # Same contract as PyTorch: residual add only valid if shapes match.
        assert stride == 1 and Cin == Cout, "need downsample params when stride!=1 or Cin!=Cout"

    # --- conv1: 3x3, stride, pad=1 -------------------------------------------------
    p1, Ho, Wo = _im2col(x_nhwc, 3, stride, 1)
    M = N * Ho * Wo
    c_pad = _round_up(Cout, _LANE)
    m_tile = _choose_m_tile(M)
    m_pad = _round_up(M, m_tile)

    def prep_patches(p):                      # zero-pad rows, cast to bf16 for the MXU
        return _pad2d(p, m_pad, p.shape[1]).astype(jnp.bfloat16)

    def prep_weight(w2d):                     # zero-pad output channels to 128 lanes
        return _pad2d(w2d, w2d.shape[0], c_pad).astype(jnp.bfloat16)

    y1, s1, q1 = _conv_matmul_pallas(prep_patches(p1), prep_weight(params["w1"]), m_tile)
    sc1, sh1 = _bn_scale_shift(s1, q1, _pad1d(params["g1"], c_pad),
                               _pad1d(params["b1"], c_pad), M, eps)
    a1 = _bn_apply_pallas(y1, sc1, sh1, m_tile, relu=True)

    # --- conv2: 3x3, stride 1, pad=1 -----------------------------------------------
    a1_nhwc = a1[:M, :Cout].reshape(N, Ho, Wo, Cout)
    p2, _, _ = _im2col(a1_nhwc, 3, 1, 1)
    y2, s2, q2 = _conv_matmul_pallas(prep_patches(p2), prep_weight(params["w2"]), m_tile)
    sc2, sh2 = _bn_scale_shift(s2, q2, _pad1d(params["g2"], c_pad),
                               _pad1d(params["b2"], c_pad), M, eps)

    # --- identity branch -------------------------------------------------------------
    if has_ds:
        pd, _, _ = _im2col(x_nhwc, 1, stride, 0)
        yd, sd, qd = _conv_matmul_pallas(prep_patches(pd), prep_weight(params["wd"]), m_tile)
        scd, shd = _bn_scale_shift(sd, qd, _pad1d(params["gd"], c_pad),
                                   _pad1d(params["bd"], c_pad), M, eps)
        identity = _bn_apply_pallas(yd, scd, shd, m_tile, relu=False)
    else:
        identity = _pad2d(x_nhwc.reshape(M, Cin), m_pad, c_pad)

    # --- bn2 + residual add + ReLU (fused) --------------------------------------------
    out = _bn_apply_pallas(y2, sc2, sh2, m_tile, residual=identity, relu=True)
    return out[:M, :Cout].reshape(N, Ho, Wo, Cout)


# -----------------------------------------------------------------------------
# Pure-JAX reference (bf16-rounded conv inputs, fp32 accumulation — mirrors the MXU path)
# -----------------------------------------------------------------------------
def _conv_ref(x, w_hwio, stride, pad):
    xb = x.astype(jnp.bfloat16).astype(jnp.float32)
    wb = w_hwio.astype(jnp.bfloat16).astype(jnp.float32)
    return jax.lax.conv_general_dilated(
        xb, wb, (stride, stride), ((pad, pad), (pad, pad)),
        dimension_numbers=("NHWC", "HWIO", "NHWC"),
        preferred_element_type=jnp.float32)


def _bn_ref(x, g, b, eps=1e-5):
    mean = x.mean(axis=(0, 1, 2), keepdims=True)
    var = x.var(axis=(0, 1, 2), keepdims=True)  # biased, like PyTorch train-mode BN
    return (x - mean) / jnp.sqrt(var + eps) * g.reshape(1, 1, 1, -1) + b.reshape(1, 1, 1, -1)


def _block_ref(x, hwio, params, stride):
    identity = x
    if "wd" in params:
        identity = _bn_ref(_conv_ref(x, hwio["wd"], stride, 0), params["gd"], params["bd"])
    out = jnp.maximum(_bn_ref(_conv_ref(x, hwio["w1"], stride, 1), params["g1"], params["b1"]), 0.0)
    out = _bn_ref(_conv_ref(out, hwio["w2"], 1, 1), params["g2"], params["b2"])
    return jnp.maximum(out + identity, 0.0)


# -----------------------------------------------------------------------------
if __name__ == "__main__":
    # BasicBlock(in_channels=4, out_channels=8, stride=2) on a (2, 4, 16, 16) input.
    N, C_IN, H, W = 2, 4, 16, 16
    C_OUT, STRIDE = 8, 2

    key = jax.random.PRNGKey(0)
    k_x, k1, k2, kd = jax.random.split(key, 4)

    w1_hwio = 0.1 * jax.random.normal(k1, (3, 3, C_IN, C_OUT), jnp.float32)
    w2_hwio = 0.1 * jax.random.normal(k2, (3, 3, C_OUT, C_OUT), jnp.float32)
    wd_hwio = 0.1 * jax.random.normal(kd, (1, 1, C_IN, C_OUT), jnp.float32)

    params = {
        "w1": w1_hwio.reshape(9 * C_IN, C_OUT),
        "g1": jnp.ones((C_OUT,), jnp.float32), "b1": jnp.zeros((C_OUT,), jnp.float32),
        "w2": w2_hwio.reshape(9 * C_OUT, C_OUT),
        "g2": jnp.ones((C_OUT,), jnp.float32), "b2": jnp.zeros((C_OUT,), jnp.float32),
        "wd": wd_hwio.reshape(C_IN, C_OUT),
        "gd": jnp.ones((C_OUT,), jnp.float32), "bd": jnp.zeros((C_OUT,), jnp.float32),
    }
    hwio = {"w1": w1_hwio, "w2": w2_hwio, "wd": wd_hwio}

    # PyTorch-convention NCHW input, transposed to NHWC for the kernels.
    x_nchw = jax.random.normal(k_x, (N, C_IN, H, W), jnp.float32)
    x_nhwc = jnp.transpose(x_nchw, (0, 2, 3, 1))

    out = basic_block_forward(x_nhwc, params, STRIDE)
    out = jax.block_until_ready(out)

    ref = _block_ref(x_nhwc, hwio, params, STRIDE)
    assert out.shape == (N, H // STRIDE, W // STRIDE, C_OUT)
    max_err = float(jnp.max(jnp.abs(out - ref)))
    assert jnp.allclose(out, ref, rtol=1e-2, atol=1e-2), f"Pallas mismatch vs reference (max abs err {max_err})"

    print("KERNEL_OK")
</pallas_src>

<mosaic_0001>
module attributes {stable_mosaic.version = 11 : i64} {
  func.func @_conv_mm_kernel(%arg0: i32, %arg1: memref<128x36xbf16, #tpu.memory_space<vmem>>, %arg2: memref<36x128xbf16, #tpu.memory_space<vmem>>, %arg3: memref<128x128xf32, #tpu.memory_space<vmem>>, %arg4: memref<1x8x128xf32, #tpu.memory_space<vmem>>, %arg5: memref<1x8x128xf32, #tpu.memory_space<vmem>>) attributes {dimension_semantics = [#tpu.dimension_semantics<parallel>], iteration_bounds = array<i64: 1>, scalar_prefetch = 0 : i64, scratch_operands = 0 : i64, tpu.core_type = #tpu.core_type<tc>, window_params = [{transform_indices = @transform_0, window_bounds = array<i64: 128, 36>}, {pipeline_mode = #tpu.pipeline_mode<synchronous>, transform_indices = @transform_1, window_bounds = array<i64: 36, 128>}, {transform_indices = @transform_2, window_bounds = array<i64: 128, 128>}, {transform_indices = @transform_3, window_bounds = array<i64: 1, 8, 128>}, {transform_indices = @transform_4, window_bounds = array<i64: 1, 8, 128>}]} {
    %c0 = arith.constant 0 : index
    %c0_0 = arith.constant 0 : index
    %0 = vector.load %arg1[%c0, %c0_0] : memref<128x36xbf16, #tpu.memory_space<vmem>>, vector<128x36xbf16>
    %c0_1 = arith.constant 0 : index
    %c0_2 = arith.constant 0 : index
    %1 = vector.load %arg2[%c0_1, %c0_2] : memref<36x128xbf16, #tpu.memory_space<vmem>>, vector<36x128xbf16>
    %cst = arith.constant dense<0.000000e+00> : vector<128x128xf32>
    %2 = tpu.matmul %0, %1, %cst {dimension_numbers = #tpu.dot_dimension_numbers<[1], [0], [0], [1], [0, 0, 1, 1], [], []>} : vector<128x36xbf16>, vector<36x128xbf16>, vector<128x128xf32> -> vector<128x128xf32>
    %c0_3 = arith.constant 0 : index
    %c0_4 = arith.constant 0 : index
    %3 = vector.load %arg3[%c0_3, %c0_4] : memref<128x128xf32, #tpu.memory_space<vmem>>, vector<128x128xf32>
    tpu.vector_store %arg3[%c0_3, %c0_4], %2 {strides = array<i32>} : memref<128x128xf32, #tpu.memory_space<vmem>>, vector<128x128xf32>,
    %cst_5 = arith.constant dense<0.000000e+00> : vector<128xf32>
    %4 = vector.multi_reduction <add>, %2, %cst_5 [0] : vector<128x128xf32> to vector<128xf32>
    %5 = vector.shape_cast %4 : vector<128xf32> to vector<1x128xf32>
    %6 = arith.mulf %2, %2 : vector<128x128xf32>
    %cst_6 = arith.constant dense<0.000000e+00> : vector<128xf32>
    %7 = vector.multi_reduction <add>, %6, %cst_6 [0] : vector<128x128xf32> to vector<128xf32>
    %8 = vector.shape_cast %7 : vector<128xf32> to vector<1x128xf32>
    %9 = vector.shape_cast %5 : vector<1x128xf32> to vector<1x1x128xf32>
    %10 = vector.shape_cast %9 : vector<1x1x128xf32> to vector<1x1x128xf32>
    %11 = vector.broadcast %10 : vector<1x1x128xf32> to vector<1x8x128xf32>
    %c0_7 = arith.constant 0 : index
    %c0_8 = arith.constant 0 : index
    %c0_9 = arith.constant 0 : index
    %12 = vector.load %arg4[%c0_7, %c0_8, %c0_9] : memref<1x8x128xf32, #tpu.memory_space<vmem>>, vector<1x8x128xf32>
    tpu.vector_store %arg4[%c0_7, %c0_8, %c0_9], %11 {strides = array<i32>} : memref<1x8x128xf32, #tpu.memory_space<vmem>>, vector<1x8x128xf32>,
    %13 = vector.shape_cast %8 : vector<1x128xf32> to vector<1x1x128xf32>
    %14 = vector.shape_cast %13 : vector<1x1x128xf32> to vector<1x1x128xf32>
    %15 = vector.broadcast %14 : vector<1x1x128xf32> to vector<1x8x128xf32>
    %c0_10 = arith.constant 0 : index
    %c0_11 = arith.constant 0 : index
    %c0_12 = arith.constant 0 : index
    %16 = vector.load %arg5[%c0_10, %c0_11, %c0_12] : memref<1x8x128xf32, #tpu.memory_space<vmem>>, vector<1x8x128xf32>
    tpu.vector_store %arg5[%c0_10, %c0_11, %c0_12], %15 {strides = array<i32>} : memref<1x8x128xf32, #tpu.memory_space<vmem>>, vector<1x8x128xf32>,
    return
  }
  func.func @transform_0(%arg0: i32) -> (i32, i32) {
    %c0_i32 = arith.constant 0 : i32
    %c0_i32_0 = arith.constant 0 : i32
    return %arg0, %c0_i32 : i32, i32
  }
  func.func @transform_1(%arg0: i32) -> (i32, i32) {
    %c0_i32 = arith.constant 0 : i32
    %c0_i32_0 = arith.constant 0 : i32
    %c0_i32_1 = arith.constant 0 : i32
    return %c0_i32, %c0_i32_0 : i32, i32
  }
  func.func @transform_2(%arg0: i32) -> (i32, i32) {
    %c0_i32 = arith.constant 0 : i32
    %c0_i32_0 = arith.constant 0 : i32
    return %arg0, %c0_i32 : i32, i32
  }
  func.func @transform_3(%arg0: i32) -> (i32, i32, i32) {
    %c0_i32 = arith.constant 0 : i32
    %c0_i32_0 = arith.constant 0 : i32
    %c0_i32_1 = arith.constant 0 : i32
    return %arg0, %c0_i32, %c0_i32_0 : i32, i32, i32
  }
  func.func @transform_4(%arg0: i32) -> (i32, i32, i32) {
    %c0_i32 = arith.constant 0 : i32
    %c0_i32_0 = arith.constant 0 : i32
    %c0_i32_1 = arith.constant 0 : i32
    return %arg0, %c0_i32, %c0_i32_0 : i32, i32, i32
  }
}

module attributes {stable_mosaic.version = 11 : i64} {
  func.func @kernel(%arg0: i32, %arg1: memref<128x128xf32, #tpu.memory_space<vmem>>, %arg2: memref<1x128xf32, #tpu.memory_space<vmem>>, %arg3: memref<1x128xf32, #tpu.memory_space<vmem>>, %arg4: memref<128x128xf32, #tpu.memory_space<vmem>>) attributes {dimension_semantics = [#tpu.dimension_semantics<parallel>], iteration_bounds = array<i64: 1>, scalar_prefetch = 0 : i64, scratch_operands = 0 : i64, tpu.core_type = #tpu.core_type<tc>, window_params = [{transform_indices = @transform_0, window_bounds = array<i64: 128, 128>}, {pipeline_mode = #tpu.pipeline_mode<synchronous>, transform_indices = @transform_1, window_bounds = array<i64: 1, 128>}, {pipeline_mode = #tpu.pipeline_mode<synchronous>, transform_indices = @transform_2, window_bounds = array<i64: 1, 128>}, {transform_indices = @transform_3, window_bounds = array<i64: 128, 128>}]} {
    %c0 = arith.constant 0 : index
    %c0_0 = arith.constant 0 : index
    %0 = vector.load %arg1[%c0, %c0_0] : memref<128x128xf32, #tpu.memory_space<vmem>>, vector<128x128xf32>
    %c0_1 = arith.constant 0 : index
    %c0_2 = arith.constant 0 : index
    %1 = vector.load %arg2[%c0_1, %c0_2] : memref<1x128xf32, #tpu.memory_space<vmem>>, vector<1x128xf32>
    %2 = vector.broadcast %1 : vector<1x128xf32> to vector<128x128xf32>
    %3 = arith.mulf %0, %2 : vector<128x128xf32>
    %c0_3 = arith.constant 0 : index
    %c0_4 = arith.constant 0 : index
    %4 = vector.load %arg3[%c0_3, %c0_4] : memref<1x128xf32, #tpu.memory_space<vmem>>, vector<1x128xf32>
    %5 = vector.broadcast %4 : vector<1x128xf32> to vector<128x128xf32>
    %6 = arith.addf %3, %5 : vector<128x128xf32>
    %cst = arith.constant 0.000000e+00 : f32
    %7 = vector.broadcast %cst : f32 to vector<128x128xf32>
    %8 = arith.maximumf %6, %7 : vector<128x128xf32>
    %c0_5 = arith.constant 0 : index
    %c0_6 = arith.constant 0 : index
    %9 = vector.load %arg4[%c0_5, %c0_6] : memref<128x128xf32, #tpu.memory_space<vmem>>, vector<128x128xf32>
    tpu.vector_store %arg4[%c0_5, %c0_6], %8 {strides = array<i32>} : memref<128x128xf32, #tpu.memory_space<vmem>>, vector<128x128xf32>,
    return
  }
  func.func @transform_0(%arg0: i32) -> (i32, i32) {
    %c0_i32 = arith.constant 0 : i32
    %c0_i32_0 = arith.constant 0 : i32
    return %arg0, %c0_i32 : i32, i32
  }
  func.func @transform_1(%arg0: i32) -> (i32, i32) {
    %c0_i32 = arith.constant 0 : i32
    %c0_i32_0 = arith.constant 0 : i32
    %c0_i32_1 = arith.constant 0 : i32
    return %c0_i32, %c0_i32_0 : i32, i32
  }
  func.func @transform_2(%arg0: i32) -> (i32, i32) {
    %c0_i32 = arith.constant 0 : i32
    %c0_i32_0 = arith.constant 0 : i32
    %c0_i32_1 = arith.constant 0 : i32
    return %c0_i32, %c0_i32_0 : i32, i32
  }
  func.func @transform_3(%arg0: i32) -> (i32, i32) {
    %c0_i32 = arith.constant 0 : i32
    %c0_i32_0 = arith.constant 0 : i32
    return %arg0, %c0_i32 : i32, i32
  }
}

module attributes {stable_mosaic.version = 11 : i64} {
  func.func @_conv_mm_kernel(%arg0: i32, %arg1: memref<128x72xbf16, #tpu.memory_space<vmem>>, %arg2: memref<72x128xbf16, #tpu.memory_space<vmem>>, %arg3: memref<128x128xf32, #tpu.memory_space<vmem>>, %arg4: memref<1x8x128xf32, #tpu.memory_space<vmem>>, %arg5: memref<1x8x128xf32, #tpu.memory_space<vmem>>) attributes {dimension_semantics = [#tpu.dimension_semantics<parallel>], iteration_bounds = array<i64: 1>, scalar_prefetch = 0 : i64, scratch_operands = 0 : i64, tpu.core_type = #tpu.core_type<tc>, window_params = [{transform_indices = @transform_0, window_bounds = array<i64: 128, 72>}, {pipeline_mode = #tpu.pipeline_mode<synchronous>, transform_indices = @transform_1, window_bounds = array<i64: 72, 128>}, {transform_indices = @transform_2, window_bounds = array<i64: 128, 128>}, {transform_indices = @transform_3, window_bounds = array<i64: 1, 8, 128>}, {transform_indices = @transform_4, window_bounds = array<i64: 1, 8, 128>}]} {
    %c0 = arith.constant 0 : index
    %c0_0 = arith.constant 0 : index
    %0 = vector.load %arg1[%c0, %c0_0] : memref<128x72xbf16, #tpu.memory_space<vmem>>, vector<128x72xbf16>
    %c0_1 = arith.constant 0 : index
    %c0_2 = arith.constant 0 : index
    %1 = vector.load %arg2[%c0_1, %c0_2] : memref<72x128xbf16, #tpu.memory_space<vmem>>, vector<72x128xbf16>
    %cst = arith.constant dense<0.000000e+00> : vector<128x128xf32>
    %2 = tpu.matmul %0, %1, %cst {dimension_numbers = #tpu.dot_dimension_numbers<[1], [0], [0], [1], [0, 0, 1, 1], [], []>} : vector<128x72xbf16>, vector<72x128xbf16>, vector<128x128xf32> -> vector<128x128xf32>
    %c0_3 = arith.constant 0 : index
    %c0_4 = arith.constant 0 : index
    %3 = vector.load %arg3[%c0_3, %c0_4] : memref<128x128xf32, #tpu.memory_space<vmem>>, vector<128x128xf32>
    tpu.vector_store %arg3[%c0_3, %c0_4], %2 {strides = array<i32>} : memref<128x128xf32, #tpu.memory_space<vmem>>, vector<128x128xf32>,
    %cst_5 = arith.constant dense<0.000000e+00> : vector<128xf32>
    %4 = vector.multi_reduction <add>, %2, %cst_5 [0] : vector<128x128xf32> to vector<128xf32>
    %5 = vector.shape_cast %4 : vector<128xf32> to vector<1x128xf32>
    %6 = arith.mulf %2, %2 : vector<128x128xf32>
    %cst_6 = arith.constant dense<0.000000e+00> : vector<128xf32>
    %7 = vector.multi_reduction <add>, %6, %cst_6 [0] : vector<128x128xf32> to vector<128xf32>
    %8 = vector.shape_cast %7 : vector<128xf32> to vector<1x128xf32>
    %9 = vector.shape_cast %5 : vector<1x128xf32> to vector<1x1x128xf32>
    %10 = vector.shape_cast %9 : vector<1x1x128xf32> to vector<1x1x128xf32>
    %11 = vector.broadcast %10 : vector<1x1x128xf32> to vector<1x8x128xf32>
    %c0_7 = arith.constant 0 : index
    %c0_8 = arith.constant 0 : index
    %c0_9 = arith.constant 0 : index
    %12 = vector.load %arg4[%c0_7, %c0_8, %c0_9] : memref<1x8x128xf32, #tpu.memory_space<vmem>>, vector<1x8x128xf32>
    tpu.vector_store %arg4[%c0_7, %c0_8, %c0_9], %11 {strides = array<i32>} : memref<1x8x128xf32, #tpu.memory_space<vmem>>, vector<1x8x128xf32>,
    %13 = vector.shape_cast %8 : vector<1x128xf32> to vector<1x1x128xf32>
    %14 = vector.shape_cast %13 : vector<1x1x128xf32> to vector<1x1x128xf32>
    %15 = vector.broadcast %14 : vector<1x1x128xf32> to vector<1x8x128xf32>
    %c0_10 = arith.constant 0 : index
    %c0_11 = arith.constant 0 : index
    %c0_12 = arith.constant 0 : index
    %16 = vector.load %arg5[%c0_10, %c0_11, %c0_12] : memref<1x8x128xf32, #tpu.memory_space<vmem>>, vector<1x8x128xf32>
    tpu.vector_store %arg5[%c0_10, %c0_11, %c0_12], %15 {strides = array<i32>} : memref<1x8x128xf32, #tpu.memory_space<vmem>>, vector<1x8x128xf32>,
    return
  }
  func.func @transform_0(%arg0: i32) -> (i32, i32) {
    %c0_i32 = arith.constant 0 : i32
    %c0_i32_0 = arith.constant 0 : i32
    return %arg0, %c0_i32 : i32, i32
  }
  func.func @transform_1(%arg0: i32) -> (i32, i32) {
    %c0_i32 = arith.constant 0 : i32
    %c0_i32_0 = arith.constant 0 : i32
    %c0_i32_1 = arith.constant 0 : i32
    return %c0_i32, %c0_i32_0 : i32, i32
  }
  func.func @transform_2(%arg0: i32) -> (i32, i32) {
    %c0_i32 = arith.constant 0 : i32
    %c0_i32_0 = arith.constant 0 : i32
    return %arg0, %c0_i32 : i32, i32
  }
  func.func @transform_3(%arg0: i32) -> (i32, i32, i32) {
    %c0_i32 = arith.constant 0 : i32
    %c0_i32_0 = arith.constant 0 : i32
    %c0_i32_1 = arith.constant 0 : i32
    return %arg0, %c0_i32, %c0_i32_0 : i32, i32, i32
  }
  func.func @transform_4(%arg0: i32) -> (i32, i32, i32) {
    %c0_i32 = arith.constant 0 : i32
    %c0_i32_0 = arith.constant 0 : i32
    %c0_i32_1 = arith.constant 0 : i32
    return %arg0, %c0_i32, %c0_i32_0 : i32, i32, i32
  }
}

module attributes {stable_mosaic.version = 11 : i64} {
  func.func @kernel(%arg0: i32, %arg1: memref<128x128xf32, #tpu.memory_space<vmem>>, %arg2: memref<1x128xf32, #tpu.memory_space<vmem>>, %arg3: memref<1x128xf32, #tpu.memory_space<vmem>>, %arg4: memref<128x128xf32, #tpu.memory_space<vmem>>) attributes {dimension_semantics = [#tpu.dimension_semantics<parallel>], iteration_bounds = array<i64: 1>, scalar_prefetch = 0 : i64, scratch_operands = 0 : i64, tpu.core_type = #tpu.core_type<tc>, window_params = [{transform_indices = @transform_0, window_bounds = array<i64: 128, 128>}, {pipeline_mode = #tpu.pipeline_mode<synchronous>, transform_indices = @transform_1, window_bounds = array<i64: 1, 128>}, {pipeline_mode = #tpu.pipeline_mode<synchronous>, transform_indices = @transform_2, window_bounds = array<i64: 1, 128>}, {transform_indices = @transform_3, window_bounds = array<i64: 128, 128>}]} {
    %c0 = arith.constant 0 : index
    %c0_0 = arith.constant 0 : index
    %0 = vector.load %arg1[%c0, %c0_0] : memref<128x128xf32, #tpu.memory_space<vmem>>, vector<128x128xf32>
    %c0_1 = arith.constant 0 : index
    %c0_2 = arith.constant 0 : index
    %1 = vector.load %arg2[%c0_1, %c0_2] : memref<1x128xf32, #tpu.memory_space<vmem>>, vector<1x128xf32>
    %2 = vector.broadcast %1 : vector<1x128xf32> to vector<128x128xf32>
    %3 = arith.mulf %0, %2 : vector<128x128xf32>
    %c0_3 = arith.constant 0 : index
    %c0_4 = arith.constant 0 : index
    %4 = vector.load %arg3[%c0_3, %c0_4] : memref<1x128xf32, #tpu.memory_space<vmem>>, vector<1x128xf32>
    %5 = vector.broadcast %4 : vector<1x128xf32> to vector<128x128xf32>
    %6 = arith.addf %3, %5 : vector<128x128xf32>
    %c0_5 = arith.constant 0 : index
    %c0_6 = arith.constant 0 : index
    %7 = vector.load %arg4[%c0_5, %c0_6] : memref<128x128xf32, #tpu.memory_space<vmem>>, vector<128x128xf32>
    tpu.vector_store %arg4[%c0_5, %c0_6], %6 {strides = array<i32>} : memref<128x128xf32, #tpu.memory_space<vmem>>, vector<128x128xf32>,
    return
  }
  func.func @transform_0(%arg0: i32) -> (i32, i32) {
    %c0_i32 = arith.constant 0 : i32
    %c0_i32_0 = arith.constant 0 : i32
    return %arg0, %c0_i32 : i32, i32
  }
  func.func @transform_1(%arg0: i32) -> (i32, i32) {
    %c0_i32 = arith.constant 0 : i32
    %c0_i32_0 = arith.constant 0 : i32
    %c0_i32_1 = arith.constant 0 : i32
    return %c0_i32, %c0_i32_0 : i32, i32
  }
  func.func @transform_2(%arg0: i32) -> (i32, i32) {
    %c0_i32 = arith.constant 0 : i32
    %c0_i32_0 = arith.constant 0 : i32
    %c0_i32_1 = arith.constant 0 : i32
    return %c0_i32, %c0_i32_0 : i32, i32
  }
  func.func @transform_3(%arg0: i32) -> (i32, i32) {
    %c0_i32 = arith.constant 0 : i32
    %c0_i32_0 = arith.constant 0 : i32
    return %arg0, %c0_i32 : i32, i32
  }
}

module attributes {stable_mosaic.version = 11 : i64} {
  func.func @_conv_mm_kernel(%arg0: i32, %arg1: memref<128x4xbf16, #tpu.memory_space<vmem>>, %arg2: memref<4x128xbf16, #tpu.memory_space<vmem>>, %arg3: memref<128x128xf32, #tpu.memory_space<vmem>>, %arg4: memref<1x8x128xf32, #tpu.memory_space<vmem>>, %arg5: memref<1x8x128xf32, #tpu.memory_space<vmem>>) attributes {dimension_semantics = [#tpu.dimension_semantics<parallel>], iteration_bounds = array<i64: 1>, scalar_prefetch = 0 : i64, scratch_operands = 0 : i64, tpu.core_type = #tpu.core_type<tc>, window_params = [{transform_indices = @transform_0, window_bounds = array<i64: 128, 4>}, {pipeline_mode = #tpu.pipeline_mode<synchronous>, transform_indices = @transform_1, window_bounds = array<i64: 4, 128>}, {transform_indices = @transform_2, window_bounds = array<i64: 128, 128>}, {transform_indices = @transform_3, window_bounds = array<i64: 1, 8, 128>}, {transform_indices = @transform_4, window_bounds = array<i64: 1, 8, 128>}]} {
    %c0 = arith.constant 0 : index
    %c0_0 = arith.constant 0 : index
    %0 = vector.load %arg1[%c0, %c0_0] : memref<128x4xbf16, #tpu.memory_space<vmem>>, vector<128x4xbf16>
    %c0_1 = arith.constant 0 : index
    %c0_2 = arith.constant 0 : index
    %1 = vector.load %arg2[%c0_1, %c0_2] : memref<4x128xbf16, #tpu.memory_space<vmem>>, vector<4x128xbf16>
    %cst = arith.constant dense<0.000000e+00> : vector<128x128xf32>
    %2 = tpu.matmul %0, %1, %cst {dimension_numbers = #tpu.dot_dimension_numbers<[1], [0], [0], [1], [0, 0, 1, 1], [], []>} : vector<128x4xbf16>, vector<4x128xbf16>, vector<128x128xf32> -> vector<128x128xf32>
    %c0_3 = arith.constant 0 : index
    %c0_4 = arith.constant 0 : index
    %3 = vector.load %arg3[%c0_3, %c0_4] : memref<128x128xf32, #tpu.memory_space<vmem>>, vector<128x128xf32>
    tpu.vector_store %arg3[%c0_3, %c0_4], %2 {strides = array<i32>} : memref<128x128xf32, #tpu.memory_space<vmem>>, vector<128x128xf32>,
    %cst_5 = arith.constant dense<0.000000e+00> : vector<128xf32>
    %4 = vector.multi_reduction <add>, %2, %cst_5 [0] : vector<128x128xf32> to vector<128xf32>
    %5 = vector.shape_cast %4 : vector<128xf32> to vector<1x128xf32>
    %6 = arith.mulf %2, %2 : vector<128x128xf32>
    %cst_6 = arith.constant dense<0.000000e+00> : vector<128xf32>
    %7 = vector.multi_reduction <add>, %6, %cst_6 [0] : vector<128x128xf32> to vector<128xf32>
    %8 = vector.shape_cast %7 : vector<128xf32> to vector<1x128xf32>
    %9 = vector.shape_cast %5 : vector<1x128xf32> to vector<1x1x128xf32>
    %10 = vector.shape_cast %9 : vector<1x1x128xf32> to vector<1x1x128xf32>
    %11 = vector.broadcast %10 : vector<1x1x128xf32> to vector<1x8x128xf32>
    %c0_7 = arith.constant 0 : index
    %c0_8 = arith.constant 0 : index
    %c0_9 = arith.constant 0 : index
    %12 = vector.load %arg4[%c0_7, %c0_8, %c0_9] : memref<1x8x128xf32, #tpu.memory_space<vmem>>, vector<1x8x128xf32>
    tpu.vector_store %arg4[%c0_7, %c0_8, %c0_9], %11 {strides = array<i32>} : memref<1x8x128xf32, #tpu.memory_space<vmem>>, vector<1x8x128xf32>,
    %13 = vector.shape_cast %8 : vector<1x128xf32> to vector<1x1x128xf32>
    %14 = vector.shape_cast %13 : vector<1x1x128xf32> to vector<1x1x128xf32>
    %15 = vector.broadcast %14 : vector<1x1x128xf32> to vector<1x8x128xf32>
    %c0_10 = arith.constant 0 : index
    %c0_11 = arith.constant 0 : index
    %c0_12 = arith.constant 0 : index
    %16 = vector.load %arg5[%c0_10, %c0_11, %c0_12] : memref<1x8x128xf32, #tpu.memory_space<vmem>>, vector<1x8x128xf32>
    tpu.vector_store %arg5[%c0_10, %c0_11, %c0_12], %15 {strides = array<i32>} : memref<1x8x128xf32, #tpu.memory_space<vmem>>, vector<1x8x128xf32>,
    return
  }
  func.func @transform_0(%arg0: i32) -> (i32, i32) {
    %c0_i32 = arith.constant 0 : i32
    %c0_i32_0 = arith.constant 0 : i32
    return %arg0, %c0_i32 : i32, i32
  }
  func.func @transform_1(%arg0: i32) -> (i32, i32) {
    %c0_i32 = arith.constant 0 : i32
    %c0_i32_0 = arith.constant 0 : i32
    %c0_i32_1 = arith.constant 0 : i32
    return %c0_i32, %c0_i32_0 : i32, i32
  }
  func.func @transform_2(%arg0: i32) -> (i32, i32) {
    %c0_i32 = arith.constant 0 : i32
    %c0_i32_0 = arith.constant 0 : i32
    return %arg0, %c0_i32 : i32, i32
  }
  func.func @transform_3(%arg0: i32) -> (i32, i32, i32) {
    %c0_i32 = arith.constant 0 : i32
    %c0_i32_0 = arith.constant 0 : i32
    %c0_i32_1 = arith.constant 0 : i32
    return %arg0, %c0_i32, %c0_i32_0 : i32, i32, i32
  }
  func.func @transform_4(%arg0: i32) -> (i32, i32, i32) {
    %c0_i32 = arith.constant 0 : i32
    %c0_i32_0 = arith.constant 0 : i32
    %c0_i32_1 = arith.constant 0 : i32
    return %arg0, %c0_i32, %c0_i32_0 : i32, i32, i32
  }
}

module attributes {stable_mosaic.version = 11 : i64} {
  func.func @kernel(%arg0: i32, %arg1: memref<128x128xf32, #tpu.memory_space<vmem>>, %arg2: memref<1x128xf32, #tpu.memory_space<vmem>>, %arg3: memref<1x128xf32, #tpu.memory_space<vmem>>, %arg4: memref<128x128xf32, #tpu.memory_space<vmem>>, %arg5: memref<128x128xf32, #tpu.memory_space<vmem>>) attributes {dimension_semantics = [#tpu.dimension_semantics<parallel>], iteration_bounds = array<i64: 1>, scalar_prefetch = 0 : i64, scratch_operands = 0 : i64, tpu.core_type = #tpu.core_type<tc>, window_params = [{transform_indices = @transform_0, window_bounds = array<i64: 128, 128>}, {pipeline_mode = #tpu.pipeline_mode<synchronous>, transform_indices = @transform_1, window_bounds = array<i64: 1, 128>}, {pipeline_mode = #tpu.pipeline_mode<synchronous>, transform_indices = @transform_2, window_bounds = array<i64: 1, 128>}, {transform_indices = @transform_3, window_bounds = array<i64: 128, 128>}, {transform_indices = @transform_4, window_bounds = array<i64: 128, 128>}]} {
    %c0 = arith.constant 0 : index
    %c0_0 = arith.constant 0 : index
    %0 = vector.load %arg1[%c0, %c0_0] : memref<128x128xf32, #tpu.memory_space<vmem>>, vector<128x128xf32>
    %c0_1 = arith.constant 0 : index
    %c0_2 = arith.constant 0 : index
    %1 = vector.load %arg2[%c0_1, %c0_2] : memref<1x128xf32, #tpu.memory_space<vmem>>, vector<1x128xf32>
    %2 = vector.broadcast %1 : vector<1x128xf32> to vector<128x128xf32>
    %3 = arith.mulf %0, %2 : vector<128x128xf32>
    %c0_3 = arith.constant 0 : index
    %c0_4 = arith.constant 0 : index
    %4 = vector.load %arg3[%c0_3, %c0_4] : memref<1x128xf32, #tpu.memory_space<vmem>>, vector<1x128xf32>
    %5 = vector.broadcast %4 : vector<1x128xf32> to vector<128x128xf32>
    %6 = arith.addf %3, %5 : vector<128x128xf32>
    %c0_5 = arith.constant 0 : index
    %c0_6 = arith.constant 0 : index
    %7 = vector.load %arg4[%c0_5, %c0_6] : memref<128x128xf32, #tpu.memory_space<vmem>>, vector<128x128xf32>
    %8 = arith.addf %6, %7 : vector<128x128xf32>
    %cst = arith.constant 0.000000e+00 : f32
    %9 = vector.broadcast %cst : f32 to vector<128x128xf32>
    %10 = arith.maximumf %8, %9 : vector<128x128xf32>
    %c0_7 = arith.constant 0 : index
    %c0_8 = arith.constant 0 : index
    %11 = vector.load %arg5[%c0_7, %c0_8] : memref<128x128xf32, #tpu.memory_space<vmem>>, vector<128x128xf32>
    tpu.vector_store %arg5[%c0_7, %c0_8], %10 {strides = array<i32>} : memref<128x128xf32, #tpu.memory_space<vmem>>, vector<128x128xf32>,
    return
  }
  func.func @transform_0(%arg0: i32) -> (i32, i32) {
    %c0_i32 = arith.constant 0 : i32
    %c0_i32_0 = arith.constant 0 : i32
    return %arg0, %c0_i32 : i32, i32
  }
  func.func @transform_1(%arg0: i32) -> (i32, i32) {
    %c0_i32 = arith.constant 0 : i32
    %c0_i32_0 = arith.constant 0 : i32
    %c0_i32_1 = arith.constant 0 : i32
    return %c0_i32, %c0_i32_0 : i32, i32
  }
  func.func @transform_2(%arg0: i32) -> (i32, i32) {
    %c0_i32 = arith.constant 0 : i32
    %c0_i32_0 = arith.constant 0 : i32
    %c0_i32_1 = arith.constant 0 : i32
    return %c0_i32, %c0_i32_0 : i32, i32
  }
  func.func @transform_3(%arg0: i32) -> (i32, i32) {
    %c0_i32 = arith.constant 0 : i32
    %c0_i32_0 = arith.constant 0 : i32
    return %arg0, %c0_i32 : i32, i32
  }
  func.func @transform_4(%arg0: i32) -> (i32, i32) {
    %c0_i32 = arith.constant 0 : i32
    %c0_i32_0 = arith.constant 0 : i32
    return %arg0, %c0_i32 : i32, i32
  }
}

</mosaic_0001>

<bundles_post_ra>
// kernel: basic_block_forward.7
= control target key start
LH: loop header
LB: loop body
LE: loop exit
PB: predicated region body
PF: predicated region fallthrough
CT: control target
= control target key end

     0   :  { %s254_s0 = inlined_call_operand.vmem [shape: f32[128,128], index: 0, kind: input, shape index: {}]   ;;  %s255_s1 = inlined_call_operand.vmem [shape: f32[1,128], index: 1, kind: input, shape index: {}]   ;;  %s256_s2 = inlined_call_operand.vmem [shape: f32[1,128], index: 2, kind: input, shape index: {}]   ;;  %s257_s3 = inlined_call_operand.vmem [shape: f32[128,128], index: 3, kind: output, shape index: {}]  }
   0x1   :  { %v14_v0 = vld [vmem:[%s254_s0] sm:$0xff]  ;;  %v15_v4 = vld [vmem:[%s254_s0 + $0x8] sm:$0xff]  ;;  %v16_v5 = vld [vmem:[%s254_s0 + $0x10] sm:$0xff] }
   0x2   :  { %v112_v1 = vld [vmem:[%s255_s1] ss:$0 sm:$0xff]  ;;  %v17_v6 = vld [vmem:[%s254_s0 + $0x18] sm:$0xff]  ;;  %v19_v11 = vld [vmem:[%s254_s0 + $0x28] sm:$0xff] }
   0x3   :  { %v143_v2 = vld [vmem:[%s256_s2] ss:$0 sm:$0xff]  ;;  %v37_v3 = vmul.f32 %v112_v1, %v14_v0  ;;  %v38_v7 = vmul.f32 %v112_v1, %v15_v4  ;;  %v39_v8 = vmul.f32 %v112_v1, %v16_v5  ;;  %v40_v9 = vmul.f32 %v112_v1, %v17_v6  ;;  %v20_v12 = vld [vmem:[%s254_s0 + $0x30] sm:$0xff]  ;;  %v21_v17 = vld [vmem:[%s254_s0 + $0x38] sm:$0xff] }
   0x4   :  { %v18_v10 = vld [vmem:[%s254_s0 + $0x20] sm:$0xff]  ;;  %v42_v15 = vmul.f32 %v112_v1, %v19_v11  ;;  %v43_v16 = vmul.f32 %v112_v1, %v20_v12  ;;  %v44_v21 = vmul.f32 %v112_v1, %v21_v17  ;;  %v23_v27 = vld [vmem:[%s254_s0 + $0x48] sm:$0xff]  ;;  %v24_v28 = vld [vmem:[%s254_s0 + $0x50] sm:$0xff] }
   0x5   :  { %v60_v13 = vadd.f32 %v143_v2, %v37_v3  ;;  %v41_v14 = vmul.f32 %v112_v1, %v18_v10  ;;  %v61_v18 = vadd.f32 %v143_v2, %v38_v7  ;;  %v62_v19 = vadd.f32 %v143_v2, %v39_v8  ;;  %v22_v22 = vld [vmem:[%s254_s0 + $0x40] sm:$0xff]  ;;  %v25_v29 = vld [vmem:[%s254_s0 + $0x58] sm:$0xff]  ;;  %v27_v35 = vld [vmem:[%s254_s0 + $0x68] sm:$0xff] }
   0x6   :  { %v63_v20 = vadd.f32 %v143_v2, %v40_v9  ;;  %v65_v25 = vadd.f32 %v143_v2, %v42_v15  ;;  %v66_v26 = vadd.f32 %v143_v2, %v43_v16  ;;  %v67_v33 = vadd.f32 %v143_v2, %v44_v21  ;;  %v26_v34 = vld [vmem:[%s254_s0 + $0x60] sm:$0xff]  ;;  %v28_v36 = vld [vmem:[%s254_s0 + $0x70] sm:$0xff]  ;;  %v29_v41 = vld [vmem:[%s254_s0 + $0x78] sm:$0xff] }
   0x7   :  { %v76_v23 = vmax.f32 %v60_v13, 0.0  ;;  %v64_v24 = vadd.f32 %v143_v2, %v41_v14  ;;  %v77_v30 = vmax.f32 %v61_v18, 0.0  ;;  %v78_v31 = vmax.f32 %v62_v19, 0.0 }
   0x8   :  { %v79_v32 = vmax.f32 %v63_v20, 0.0  ;;  %v81_v38 = vmax.f32 %v65_v25, 0.0  ;;  %v82_v39 = vmax.f32 %v66_v26, 0.0  ;;  %v45_v40 = vmul.f32 %v112_v1, %v22_v22 }
   0x9   :  { %92 = vst [vmem:[%s257_s3] sm:$0xff] %v76_v23  ;;  %v80_v37 = vmax.f32 %v64_v24, 0.0  ;;  %93 = vst [vmem:[%s257_s3 + $0x8] sm:$0xff] %v77_v30  ;;  %v83_v42 = vmax.f32 %v67_v33, 0.0  ;;  %v46_v43 = vmul.f32 %v112_v1, %v23_v27  ;;  %v47_v44 = vmul.f32 %v112_v1, %v24_v28 }
   0xa   :  { %94 = vst [vmem:[%s257_s3 + $0x10] sm:$0xff] %v78_v31  ;;  %95 = vst [vmem:[%s257_s3 + $0x18] sm:$0xff] %v79_v32  ;;  %v48_v45 = vmul.f32 %v112_v1, %v25_v29  ;;  %v68_v46 = vadd.f32 %v143_v2, %v45_v40  ;;  %v49_v47 = vmul.f32 %v112_v1, %v26_v34 }
   0xb   :  { %96 = vst [vmem:[%s257_s3 + $0x20] sm:$0xff] %v80_v37  ;;  %97 = vst [vmem:[%s257_s3 + $0x28] sm:$0xff] %v81_v38  ;;  %v50_v48 = vmul.f32 %v112_v1, %v27_v35  ;;  %v51_v49 = vmul.f32 %v112_v1, %v28_v36  ;;  %v69_v50 = vadd.f32 %v143_v2, %v46_v43 }
   0xc   :  { %98 = vst [vmem:[%s257_s3 + $0x30] sm:$0xff] %v82_v39  ;;  %99 = vst [vmem:[%s257_s3 + $0x38] sm:$0xff] %v83_v42  ;;  %v70_v51 = vadd.f32 %v143_v2, %v47_v44  ;;  %v71_v52 = vadd.f32 %v143_v2, %v48_v45  ;;  %v52_v53 = vmul.f32 %v112_v1, %v29_v41  ;;  %v84_v54 = vmax.f32 %v68_v46, 0.0 }
   0xd   :  { %v72_v55 = vadd.f32 %v143_v2, %v49_v47  ;;  %v73_v56 = vadd.f32 %v143_v2, %v50_v48  ;;  %v74_v57 = vadd.f32 %v143_v2, %v51_v49  ;;  %v85_v58 = vmax.f32 %v69_v50, 0.0 }
   0xe   :  { %v86_v59 = vmax.f32 %v70_v51, 0.0  ;;  %v87_v60 = vmax.f32 %v71_v52, 0.0  ;;  %v75_v61 = vadd.f32 %v143_v2, %v52_v53  ;;  %100 = vst [vmem:[%s257_s3 + $0x40] sm:$0xff] %v84_v54 }
   0xf   :  { %v88_v62 = vmax.f32 %v72_v55, 0.0  ;;  %v89_v63 = vmax.f32 %v73_v56, 0.0  ;;  %v90_v0 = vmax.f32 %v74_v57, 0.0  ;;  %101 = vst [vmem:[%s257_s3 + $0x48] sm:$0xff] %v85_v58 }
  0x10   :  { %102 = vst [vmem:[%s257_s3 + $0x50] sm:$0xff] %v86_v59  ;;  %103 = vst [vmem:[%s257_s3 + $0x58] sm:$0xff] %v87_v60  ;;  %v91_v1 = vmax.f32 %v75_v61, 0.0 }
  0x11   :  { %104 = vst [vmem:[%s257_s3 + $0x60] sm:$0xff] %v88_v62  ;;  %105 = vst [vmem:[%s257_s3 + $0x68] sm:$0xff] %v89_v63 }
  0x12   :  { %106 = vst [vmem:[%s257_s3 + $0x70] sm:$0xff] %v90_v0  ;;  %107 = vst [vmem:[%s257_s3 + $0x78] sm:$0xff] %v91_v1 }

// kernel: basic_block_forward.6
= control target key start
LH: loop header
LB: loop body
LE: loop exit
PB: predicated region body
PF: predicated region fallthrough
CT: control target
= control target key end

     0   :  { %vm91_vm0 = vcmask 293888   ;;  %vm116_vm1 = vcmask 1041408   ;;  %s496_s1 = inlined_call_operand.vmem [shape: bf16[36,128], index: 1, kind: input, shape index: {}]   ;;  %s497_s0 = inlined_call_operand.vmem [shape: bf16[128,36], index: 0, kind: input, shape index: {}]   ;;  %s498_s2 = inlined_call_operand.vmem [shape: f32[128,128], index: 2, kind: output, shape index: {0}]   ;;  %s499_s3 = inlined_call_operand.vmem [shape: f32[1,8,128], index: 3, kind: output, shape index: {1}]   ;;  %s500_s4 = inlined_call_operand.vmem [shape: f32[1,8,128], index: 4, kind: output, shape index: {2}]  }
   0x1   :  { %v365_v0 = vld [vmem:[%s496_s1] sm:$0xff]   ;;  %v366_v1 = vld [vmem:[%s496_s1 + $0x8] sm:$0xff]   ;;  %v367_v2 = vld [vmem:[%s496_s1 + $0x10] ss:$0 sps:$4 sm:$0x33]  }
   0x2   :  { %335 = vmatprep.subr.bf16.mxu0 %v365_v0  ;;  %v368_v3 = vld [vmem:[%s497_s0] sm:$0xff]   ;;  %357 = vmatprep.subr.bf16.mxu1 %v365_v0  ;;  %v118_v5 = vsel %vm116_vm1, %v367_v2, 0  ;;  %v369_v6 = vld [vmem:[%s497_s0 + $0x8] sm:$0xff]   ;;  %v370_v8 = vld [vmem:[%s497_s0 + $0x10] sm:$0xff]  }
   0x3   :  { %336 = vmatpush3.bf16.msra.mxu0 %v365_v0  ;;  %360 = vmatpush3.bf16.msra.mxu1 %v365_v0  ;;  %v372_v4 = vld [vmem:[%s497_s0 + $0x20] sm:$0xff]   ;;  %v373_v7 = vld [vmem:[%s497_s0 + $0x28] sm:$0xff]   ;;  %v374_v9 = vld [vmem:[%s497_s0 + $0x30] sm:$0xff]  }
   0x4   :  { %337 = vmatprep.subr.bf16.mxu0 %v366_v1  ;;  %341 = vmatprep.mubr.msk.bf16.mxu0 %vm91_vm0, %v368_v3  ;;  %v371_v10 = vld [vmem:[%s497_s0 + $0x18] sm:$0xff]  }
   0x5   :  { %358 = vmatprep.subr.bf16.mxu1 %v366_v1  ;;  %349 = vmatprep.mubr.msk.bf16.mxu1 %vm91_vm0, %v372_v4  ;;  %v375_v11 = vld [vmem:[%s497_s0 + $0x38] sm:$0xff]  }
   0x7   :  { %338 = vmatpush3.bf16.msra.mxu0 %v366_v1  ;;  %361 = vmatpush3.bf16.msra.mxu1 %v366_v1 }
   0x8   :  { %363 = vmatprep.subr.msk.bf16.mxu0 %vm116_vm1, %v367_v2  ;;  %364 = vmatprep.subr.msk.bf16.mxu1 %vm116_vm1, %v367_v2 }
   0xb   :  { %340 = vmatpush3.bf16.msra.mxu0 %v118_v5  ;;  %362 = vmatpush3.bf16.msra.mxu1 %v118_v5 }
   0xe   :  { %342 = vmatmul.mubr.msk.bf16.vlgmr.msra.gmra.mrb[0].mxu0 %vm91_vm0, %v369_v6  ;;  %350 = vmatmul.mubr.msk.bf16.vlgmr.msra.gmra.mrb[0].mxu1 %vm91_vm0, %v373_v7 }
   0xf   :  { %345 = vmatprep.mubr.msk.bf16.mxu0 %vm91_vm0, %v370_v8  ;;  %353 = vmatprep.mubr.msk.bf16.mxu1 %vm91_vm0, %v374_v9 }
  0x16   :  { %346 = vmatmul.mubr.msk.bf16.gmra.mrb[4].mxu0 %vm91_vm0, %v371_v10  ;;  %354 = vmatmul.mubr.msk.bf16.gmra.mrb[4].mxu1 %vm91_vm0, %v375_v11 }
  0xe1   :  { %v343_v12 = vpop.f32.mrb[0].mxu0  ;;  %v351_v13 = vpop.f32.mrb[0].mxu1 }
  0xe2   :  { %219 = vst [vmem:[%s498_s2 + $0x10] sm:$0xff] %v343_v12  ;;  %v154_v14 = vpop.f32.mrb[1].mxu0  ;;  %227 = vst [vmem:[%s498_s2 + $0x50] sm:$0xff] %v351_v13  ;;  %v186_v15 = vpop.f32.mrb[1].mxu1  ;;  %v256_v23 = vmul.f32 %v343_v12, %v343_v12  ;;  %v264_v55 = vmul.f32 %v351_v13, %v351_v13 }
  0xe3   :  { %217 = vst [vmem:[%s498_s2] sm:$0xff] %v154_v14  ;;  %v344_v16 = vpop.f32.mrb[2].mxu0  ;;  %225 = vst [vmem:[%s498_s2 + $0x40] sm:$0xff] %v186_v15  ;;  %v352_v17 = vpop.f32.mrb[2].mxu1  ;;  %v254_v20 = vmul.f32 %v154_v14, %v154_v14  ;;  %v262_v49 = vmul.f32 %v186_v15, %v186_v15 }
  0xe4   :  { %220 = vst [vmem:[%s498_s2 + $0x18] sm:$0xff] %v344_v16  ;;  %v157_v18 = vpop.f32.mrb[3].mxu0  ;;  %228 = vst [vmem:[%s498_s2 + $0x58] sm:$0xff] %v352_v17  ;;  %v189_v19 = vpop.f32.mrb[3].mxu1  ;;  %v257_v26 = vmul.f32 %v344_v16, %v344_v16  ;;  %v265_v58 = vmul.f32 %v352_v17, %v352_v17 }
  0xe5   :  { %218 = vst [vmem:[%s498_s2 + $0x8] sm:$0xff] %v157_v18  ;;  %v233_v21 = vadd.f32 %v157_v18, %v154_v14  ;;  %v255_v22 = vmul.f32 %v157_v18, %v157_v18  ;;  %226 = vst [vmem:[%s498_s2 + $0x48] sm:$0xff] %v189_v19  ;;  %v263_v54 = vmul.f32 %v189_v19, %v189_v19 }
  0xe7   :  { %v234_v24 = vadd.f32 %v343_v12, %v233_v21  ;;  %v270_v25 = vadd.f32 %v255_v22, %v254_v20 }
  0xe9   :  { %v271_v27 = vadd.f32 %v270_v25, %v256_v23  ;;  %v347_v28 = vpop.f32.mrb[4].mxu0  ;;  %v235_v29 = vadd.f32 %v344_v16, %v234_v24  ;;  %v355_v30 = vpop.f32.mrb[4].mxu1 }
  0xea   :  { %223 = vst [vmem:[%s498_s2 + $0x30] sm:$0xff] %v347_v28  ;;  %v170_v31 = vpop.f32.mrb[5].mxu0  ;;  %231 = vst [vmem:[%s498_s2 + $0x70] sm:$0xff] %v355_v30  ;;  %v202_v32 = vpop.f32.mrb[5].mxu1  ;;  %v260_v43 = vmul.f32 %v347_v28, %v347_v28  ;;  %v268_v3 = vmul.f32 %v355_v30, %v355_v30 }
  0xeb   :  { %221 = vst [vmem:[%s498_s2 + $0x20] sm:$0xff] %v170_v31  ;;  %v236_v33 = vadd.f32 %v235_v29, %v170_v31  ;;  %v258_v34 = vmul.f32 %v170_v31, %v170_v31  ;;  %v272_v35 = vadd.f32 %v271_v27, %v257_v26  ;;  %v348_v36 = vpop.f32.mrb[6].mxu0  ;;  %229 = vst [vmem:[%s498_s2 + $0x60] sm:$0xff] %v202_v32  ;;  %v356_v37 = vpop.f32.mrb[6].mxu1 }
  0xec   :  { %224 = vst [vmem:[%s498_s2 + $0x38] sm:$0xff] %v348_v36  ;;  %v173_v38 = vpop.f32.mrb[7].mxu0  ;;  %232 = vst [vmem:[%s498_s2 + $0x78] sm:$0xff] %v356_v37  ;;  %v205_v39 = vpop.f32.mrb[7].mxu1  ;;  %v261_v46 = vmul.f32 %v348_v36, %v348_v36  ;;  %v266_v61 = vmul.f32 %v202_v32, %v202_v32  ;;  %v269_v6 = vmul.f32 %v356_v37, %v356_v37 }
  0xed   :  { %v273_v40 = vadd.f32 %v272_v35, %v258_v34  ;;  %222 = vst [vmem:[%s498_s2 + $0x28] sm:$0xff] %v173_v38  ;;  %v237_v41 = vadd.f32 %v236_v33, %v173_v38  ;;  %v259_v42 = vmul.f32 %v173_v38, %v173_v38  ;;  %230 = vst [vmem:[%s498_s2 + $0x68] sm:$0xff] %v205_v39 }
  0xee   :  { %v267_v2 = vmul.f32 %v205_v39, %v205_v39 }
  0xef   :  { %v238_v44 = vadd.f32 %v347_v28, %v237_v41  ;;  %v274_v45 = vadd.f32 %v273_v40, %v259_v42 }
  0xf1   :  { %v275_v47 = vadd.f32 %v274_v45, %v260_v43  ;;  %v239_v48 = vadd.f32 %v348_v36, %v238_v44 }
  0xf3   :  { %v240_v50 = vadd.f32 %v239_v48, %v186_v15  ;;  %v276_v51 = vadd.f32 %v275_v47, %v261_v46 }
  0xf5   :  { %v277_v52 = vadd.f32 %v276_v51, %v262_v49  ;;  %v241_v53 = vadd.f32 %v240_v50, %v189_v19 }
  0xf7   :  { %v242_v56 = vadd.f32 %v351_v13, %v241_v53  ;;  %v278_v57 = vadd.f32 %v277_v52, %v263_v54 }
  0xf9   :  { %v279_v59 = vadd.f32 %v278_v57, %v264_v55  ;;  %v243_v60 = vadd.f32 %v352_v17, %v242_v56 }
  0xfb   :  { %v244_v62 = vadd.f32 %v243_v60, %v202_v32  ;;  %v280_v63 = vadd.f32 %v279_v59, %v265_v58 }
  0xfd   :  { %v281_v0 = vadd.f32 %v280_v63, %v266_v61  ;;  %v245_v1 = vadd.f32 %v244_v62, %v205_v39 }
  0xff   :  { %v246_v4 = vadd.f32 %v355_v30, %v245_v1  ;;  %v282_v5 = vadd.f32 %v281_v0, %v267_v2 }
 0x101   :  { %v247_v7 = vadd.f32 %v356_v37, %v246_v4  ;;  %v283_v8 = vadd.f32 %v282_v5, %v268_v3 }
 0x103   :  { %v248_v9 = vrot.slane %v247_v7, 4  ;;  %v284_v10 = vadd.f32 %v283_v8, %v269_v6 }
 0x105   :  { %v249_v11 = vadd.f32 %v248_v9, %v247_v7  ;;  %v285_v12 = vrot.slane %v284_v10, 4 }
 0x107   :  { %v250_v13 = vrot.slane %v249_v11, 2  ;;  %v286_v14 = vadd.f32 %v285_v12, %v284_v10 }
 0x109   :  { %v251_v15 = vadd.f32 %v250_v13, %v249_v11  ;;  %v287_v16 = vrot.slane %v286_v14, 2 }
 0x10b   :  { %v252_v17 = vrot.slane %v251_v15, 1  ;;  %v288_v18 = vadd.f32 %v287_v16, %v286_v14 }
 0x10d   :  { %v253_v19 = vadd.f32 %v252_v17, %v251_v15  ;;  %v289_v20 = vrot.slane %v288_v18, 1 }
 0x10f   :  { %v290_v21 = vadd.f32 %v289_v20, %v288_v18  ;;  %291 = vst [vmem:[%s499_s3] sm:$0xff] %v253_v19 }
 0x111   :  { %292 = vst [vmem:[%s500_s4] sm:$0xff] %v290_v21 }

// kernel: basic_block_forward.8
= control target key start
LH: loop header
LB: loop body
LE: loop exit
PB: predicated region body
PF: predicated region fallthrough
CT: control target
= control target key end

     0   :  { %vm107_vm0 = vcmask 588800   ;;  %vm132_vm1 = vcmask 1043456   ;;  %s532_s1 = inlined_call_operand.vmem [shape: bf16[72,128], index: 1, kind: input, shape index: {}]   ;;  %s533_s0 = inlined_call_operand.vmem [shape: bf16[128,72], index: 0, kind: input, shape index: {}]   ;;  %s534_s2 = inlined_call_operand.vmem [shape: f32[128,128], index: 2, kind: output, shape index: {0}]   ;;  %s535_s3 = inlined_call_operand.vmem [shape: f32[1,8,128], index: 3, kind: output, shape index: {1}]   ;;  %s536_s4 = inlined_call_operand.vmem [shape: f32[1,8,128], index: 4, kind: output, shape index: {2}]  }
   0x1   :  { %v393_v0 = vld [vmem:[%s532_s1] sm:$0xff]   ;;  %v394_v1 = vld [vmem:[%s532_s1 + $0x8] sm:$0xff]   ;;  %v395_v2 = vld [vmem:[%s532_s1 + $0x10] sm:$0xff]  }
   0x2   :  { %355 = vmatprep.subr.bf16.mxu0 %v393_v0  ;;  %381 = vmatprep.subr.bf16.mxu1 %v393_v0  ;;  %v398_v3 = vld [vmem:[%s533_s0] sm:$0xff]   ;;  %v396_v4 = vld [vmem:[%s532_s1 + $0x18] sm:$0xff]   ;;  %v399_v8 = vld [vmem:[%s533_s0 + $0x8] sm:$0xff]  }
   0x3   :  { %356 = vmatpush3.bf16.msra.mxu0 %v393_v0  ;;  %386 = vmatpush3.bf16.msra.mxu1 %v393_v0  ;;  %v402_v5 = vld [vmem:[%s533_s0 + $0x20] sm:$0xff]   ;;  %v403_v9 = vld [vmem:[%s533_s0 + $0x28] sm:$0xff]   ;;  %v400_v10 = vld [vmem:[%s533_s0 + $0x10] sm:$0xff]  }
   0x4   :  { %357 = vmatprep.subr.bf16.mxu0 %v394_v1  ;;  %382 = vmatprep.subr.bf16.mxu1 %v394_v1  ;;  %v397_v6 = vld [vmem:[%s532_s1 + $0x20] ss:$0 sps:$4 sm:$0xff]   ;;  %v404_v11 = vld [vmem:[%s533_s0 + $0x30] sm:$0xff]   ;;  %v401_v12 = vld [vmem:[%s533_s0 + $0x18] sm:$0xff]  }
   0x5   :  { %365 = vmatprep.mubr.msk.bf16.mxu0 %vm107_vm0, %v398_v3  ;;  %373 = vmatprep.mubr.msk.bf16.mxu1 %vm107_vm0, %v402_v5  ;;  %v134_v7 = vsel %vm132_vm1, %v397_v6, 0  ;;  %v405_v13 = vld [vmem:[%s533_s0 + $0x38] sm:$0xff]  }
   0x7   :  { %358 = vmatpush3.bf16.msra.mxu0 %v394_v1  ;;  %387 = vmatpush3.bf16.msra.mxu1 %v394_v1 }
   0x8   :  { %359 = vmatprep.subr.bf16.mxu0 %v395_v2  ;;  %383 = vmatprep.subr.bf16.mxu1 %v395_v2 }
   0xb   :  { %360 = vmatpush3.bf16.msra.mxu0 %v395_v2  ;;  %388 = vmatpush3.bf16.msra.mxu1 %v395_v2 }
   0xc   :  { %361 = vmatprep.subr.bf16.mxu0 %v396_v4  ;;  %384 = vmatprep.subr.bf16.mxu1 %v396_v4 }
   0xf   :  { %362 = vmatpush3.bf16.msra.mxu0 %v396_v4  ;;  %389 = vmatpush3.bf16.msra.mxu1 %v396_v4 }
  0x10   :  { %391 = vmatprep.subr.msk.bf16.mxu0 %vm132_vm1, %v397_v6  ;;  %392 = vmatprep.subr.msk.bf16.mxu1 %vm132_vm1, %v397_v6 }
  0x13   :  { %364 = vmatpush3.bf16.msra.mxu0 %v134_v7  ;;  %390 = vmatpush3.bf16.msra.mxu1 %v134_v7 }
  0x16   :  { %366 = vmatmul.mubr.msk.bf16.vlgmr.msra.gmra.mrb[0].mxu0 %vm107_vm0, %v399_v8  ;;  %374 = vmatmul.mubr.msk.bf16.vlgmr.msra.gmra.mrb[0].mxu1 %vm107_vm0, %v403_v9 }
  0x17   :  { %369 = vmatprep.mubr.msk.bf16.mxu0 %vm107_vm0, %v400_v10  ;;  %377 = vmatprep.mubr.msk.bf16.mxu1 %vm107_vm0, %v404_v11 }
  0x1e   :  { %370 = vmatmul.mubr.msk.bf16.gmra.mrb[4].mxu0 %vm107_vm0, %v401_v12  ;;  %378 = vmatmul.mubr.msk.bf16.gmra.mrb[4].mxu1 %vm107_vm0, %v405_v13 }
  0xe9   :  { %v367_v14 = vpop.f32.mrb[0].mxu0  ;;  %v375_v15 = vpop.f32.mrb[0].mxu1 }
  0xea   :  { %235 = vst [vmem:[%s534_s2 + $0x10] sm:$0xff] %v367_v14  ;;  %v170_v16 = vpop.f32.mrb[1].mxu0  ;;  %243 = vst [vmem:[%s534_s2 + $0x50] sm:$0xff] %v375_v15  ;;  %v202_v17 = vpop.f32.mrb[1].mxu1  ;;  %v272_v25 = vmul.f32 %v367_v14, %v367_v14  ;;  %v280_v57 = vmul.f32 %v375_v15, %v375_v15 }
  0xeb   :  { %233 = vst [vmem:[%s534_s2] sm:$0xff] %v170_v16  ;;  %v368_v18 = vpop.f32.mrb[2].mxu0  ;;  %241 = vst [vmem:[%s534_s2 + $0x40] sm:$0xff] %v202_v17  ;;  %v376_v19 = vpop.f32.mrb[2].mxu1  ;;  %v270_v22 = vmul.f32 %v170_v16, %v170_v16  ;;  %v278_v51 = vmul.f32 %v202_v17, %v202_v17 }
  0xec   :  { %236 = vst [vmem:[%s534_s2 + $0x18] sm:$0xff] %v368_v18  ;;  %v173_v20 = vpop.f32.mrb[3].mxu0  ;;  %244 = vst [vmem:[%s534_s2 + $0x58] sm:$0xff] %v376_v19  ;;  %v205_v21 = vpop.f32.mrb[3].mxu1  ;;  %v273_v28 = vmul.f32 %v368_v18, %v368_v18  ;;  %v281_v60 = vmul.f32 %v376_v19, %v376_v19 }
  0xed   :  { %234 = vst [vmem:[%s534_s2 + $0x8] sm:$0xff] %v173_v20  ;;  %v249_v23 = vadd.f32 %v173_v20, %v170_v16  ;;  %v271_v24 = vmul.f32 %v173_v20, %v173_v20  ;;  %242 = vst [vmem:[%s534_s2 + $0x48] sm:$0xff] %v205_v21  ;;  %v279_v56 = vmul.f32 %v205_v21, %v205_v21 }
  0xef   :  { %v250_v26 = vadd.f32 %v367_v14, %v249_v23  ;;  %v286_v27 = vadd.f32 %v271_v24, %v270_v22 }
  0xf1   :  { %v287_v29 = vadd.f32 %v286_v27, %v272_v25  ;;  %v371_v30 = vpop.f32.mrb[4].mxu0  ;;  %v251_v31 = vadd.f32 %v368_v18, %v250_v26  ;;  %v379_v32 = vpop.f32.mrb[4].mxu1 }
  0xf2   :  { %239 = vst [vmem:[%s534_s2 + $0x30] sm:$0xff] %v371_v30  ;;  %v186_v33 = vpop.f32.mrb[5].mxu0  ;;  %247 = vst [vmem:[%s534_s2 + $0x70] sm:$0xff] %v379_v32  ;;  %v218_v34 = vpop.f32.mrb[5].mxu1  ;;  %v276_v45 = vmul.f32 %v371_v30, %v371_v30  ;;  %v284_v5 = vmul.f32 %v379_v32, %v379_v32 }
  0xf3   :  { %237 = vst [vmem:[%s534_s2 + $0x20] sm:$0xff] %v186_v33  ;;  %v252_v35 = vadd.f32 %v251_v31, %v186_v33  ;;  %v274_v36 = vmul.f32 %v186_v33, %v186_v33  ;;  %v288_v37 = vadd.f32 %v287_v29, %v273_v28  ;;  %v372_v38 = vpop.f32.mrb[6].mxu0  ;;  %245 = vst [vmem:[%s534_s2 + $0x60] sm:$0xff] %v218_v34  ;;  %v380_v39 = vpop.f32.mrb[6].mxu1 }
  0xf4   :  { %240 = vst [vmem:[%s534_s2 + $0x38] sm:$0xff] %v372_v38  ;;  %v189_v40 = vpop.f32.mrb[7].mxu0  ;;  %248 = vst [vmem:[%s534_s2 + $0x78] sm:$0xff] %v380_v39  ;;  %v221_v41 = vpop.f32.mrb[7].mxu1  ;;  %v277_v48 = vmul.f32 %v372_v38, %v372_v38  ;;  %v282_v63 = vmul.f32 %v218_v34, %v218_v34  ;;  %v285_v8 = vmul.f32 %v380_v39, %v380_v39 }
  0xf5   :  { %v289_v42 = vadd.f32 %v288_v37, %v274_v36  ;;  %238 = vst [vmem:[%s534_s2 + $0x28] sm:$0xff] %v189_v40  ;;  %v253_v43 = vadd.f32 %v252_v35, %v189_v40  ;;  %v275_v44 = vmul.f32 %v189_v40, %v189_v40  ;;  %246 = vst [vmem:[%s534_s2 + $0x68] sm:$0xff] %v221_v41 }
  0xf6   :  { %v283_v4 = vmul.f32 %v221_v41, %v221_v41 }
  0xf7   :  { %v254_v46 = vadd.f32 %v371_v30, %v253_v43  ;;  %v290_v47 = vadd.f32 %v289_v42, %v275_v44 }
  0xf9   :  { %v291_v49 = vadd.f32 %v290_v47, %v276_v45  ;;  %v255_v50 = vadd.f32 %v372_v38, %v254_v46 }
  0xfb   :  { %v256_v52 = vadd.f32 %v255_v50, %v202_v17  ;;  %v292_v53 = vadd.f32 %v291_v49, %v277_v48 }
  0xfd   :  { %v293_v54 = vadd.f32 %v292_v53, %v278_v51  ;;  %v257_v55 = vadd.f32 %v256_v52, %v205_v21 }
  0xff   :  { %v258_v58 = vadd.f32 %v375_v15, %v257_v55  ;;  %v294_v59 = vadd.f32 %v293_v54, %v279_v56 }
 0x101   :  { %v295_v61 = vadd.f32 %v294_v59, %v280_v57  ;;  %v259_v62 = vadd.f32 %v376_v19, %v258_v58 }
 0x103   :  { %v260_v0 = vadd.f32 %v259_v62, %v218_v34  ;;  %v296_v1 = vadd.f32 %v295_v61, %v281_v60 }
 0x105   :  { %v297_v2 = vadd.f32 %v296_v1, %v282_v63  ;;  %v261_v3 = vadd.f32 %v260_v0, %v221_v41 }
 0x107   :  { %v262_v6 = vadd.f32 %v379_v32, %v261_v3  ;;  %v298_v7 = vadd.f32 %v297_v2, %v283_v4 }
 0x109   :  { %v263_v9 = vadd.f32 %v380_v39, %v262_v6  ;;  %v299_v10 = vadd.f32 %v298_v7, %v284_v5 }
 0x10b   :  { %v264_v11 = vrot.slane %v263_v9, 4  ;;  %v300_v12 = vadd.f32 %v299_v10, %v285_v8 }
 0x10d   :  { %v265_v13 = vadd.f32 %v264_v11, %v263_v9  ;;  %v301_v14 = vrot.slane %v300_v12, 4 }
 0x10f   :  { %v266_v15 = vrot.slane %v265_v13, 2  ;;  %v302_v16 = vadd.f32 %v301_v14, %v300_v12 }
 0x111   :  { %v267_v17 = vadd.f32 %v266_v15, %v265_v13  ;;  %v303_v18 = vrot.slane %v302_v16, 2 }
 0x113   :  { %v268_v19 = vrot.slane %v267_v17, 1  ;;  %v304_v20 = vadd.f32 %v303_v18, %v302_v16 }
 0x115   :  { %v269_v21 = vadd.f32 %v268_v19, %v267_v17  ;;  %v305_v22 = vrot.slane %v304_v20, 1 }
 0x117   :  { %v306_v23 = vadd.f32 %v305_v22, %v304_v20  ;;  %307 = vst [vmem:[%s535_s3] sm:$0xff] %v269_v21 }
 0x119   :  { %308 = vst [vmem:[%s536_s4] sm:$0xff] %v306_v23 }

// kernel: basic_block_forward.10
= control target key start
LH: loop header
LB: loop body
LE: loop exit
PB: predicated region body
PF: predicated region fallthrough
CT: control target
= control target key end

     0   :  { %s220_s0 = inlined_call_operand.vmem [shape: f32[128,128], index: 0, kind: input, shape index: {}]   ;;  %s221_s1 = inlined_call_operand.vmem [shape: f32[1,128], index: 1, kind: input, shape index: {}]   ;;  %s222_s2 = inlined_call_operand.vmem [shape: f32[1,128], index: 2, kind: input, shape index: {}]   ;;  %s223_s3 = inlined_call_operand.vmem [shape: f32[128,128], index: 3, kind: output, shape index: {}]  }
   0x1   :  { %v14_v0 = vld [vmem:[%s220_s0] sm:$0xff]  ;;  %v15_v4 = vld [vmem:[%s220_s0 + $0x8] sm:$0xff]  ;;  %v16_v5 = vld [vmem:[%s220_s0 + $0x10] sm:$0xff] }
   0x2   :  { %v96_v1 = vld [vmem:[%s221_s1] ss:$0 sm:$0xff]  ;;  %v17_v6 = vld [vmem:[%s220_s0 + $0x18] sm:$0xff]  ;;  %v19_v11 = vld [vmem:[%s220_s0 + $0x28] sm:$0xff] }
   0x3   :  { %v97_v2 = vld [vmem:[%s222_s2] ss:$0 sm:$0xff]  ;;  %v37_v3 = vmul.f32 %v96_v1, %v14_v0  ;;  %v38_v7 = vmul.f32 %v96_v1, %v15_v4  ;;  %v39_v8 = vmul.f32 %v96_v1, %v16_v5  ;;  %v40_v9 = vmul.f32 %v96_v1, %v17_v6  ;;  %v20_v12 = vld [vmem:[%s220_s0 + $0x30] sm:$0xff]  ;;  %v21_v17 = vld [vmem:[%s220_s0 + $0x38] sm:$0xff] }
   0x4   :  { %v18_v10 = vld [vmem:[%s220_s0 + $0x20] sm:$0xff]  ;;  %v42_v15 = vmul.f32 %v96_v1, %v19_v11  ;;  %v43_v16 = vmul.f32 %v96_v1, %v20_v12  ;;  %v23_v19 = vld [vmem:[%s220_s0 + $0x48] sm:$0xff]  ;;  %v44_v23 = vmul.f32 %v96_v1, %v21_v17  ;;  %v24_v24 = vld [vmem:[%s220_s0 + $0x50] sm:$0xff] }
   0x5   :  { %v60_v13 = vadd.f32 %v97_v2, %v37_v3  ;;  %v41_v14 = vmul.f32 %v96_v1, %v18_v10  ;;  %v22_v18 = vld [vmem:[%s220_s0 + $0x40] sm:$0xff]  ;;  %v61_v20 = vadd.f32 %v97_v2, %v38_v7  ;;  %v62_v21 = vadd.f32 %v97_v2, %v39_v8  ;;  %v25_v25 = vld [vmem:[%s220_s0 + $0x58] sm:$0xff]  ;;  %v27_v31 = vld [vmem:[%s220_s0 + $0x68] sm:$0xff] }
   0x6   :  { %v63_v22 = vadd.f32 %v97_v2, %v40_v9  ;;  %v26_v26 = vld [vmem:[%s220_s0 + $0x60] sm:$0xff]  ;;  %v65_v28 = vadd.f32 %v97_v2, %v42_v15  ;;  %v66_v29 = vadd.f32 %v97_v2, %v43_v16  ;;  %v45_v30 = vmul.f32 %v96_v1, %v22_v18  ;;  %v28_v32 = vld [vmem:[%s220_s0 + $0x70] sm:$0xff]  ;;  %v29_v33 = vld [vmem:[%s220_s0 + $0x78] sm:$0xff] }
   0x7   :  { %76 = vst [vmem:[%s223_s3] sm:$0xff] %v60_v13  ;;  %v64_v27 = vadd.f32 %v97_v2, %v41_v14  ;;  %77 = vst [vmem:[%s223_s3 + $0x8] sm:$0xff] %v61_v20  ;;  %v67_v34 = vadd.f32 %v97_v2, %v44_v23  ;;  %v46_v35 = vmul.f32 %v96_v1, %v23_v19 }
   0x8   :  { %78 = vst [vmem:[%s223_s3 + $0x10] sm:$0xff] %v62_v21  ;;  %79 = vst [vmem:[%s223_s3 + $0x18] sm:$0xff] %v63_v22  ;;  %v47_v36 = vmul.f32 %v96_v1, %v24_v24  ;;  %v48_v37 = vmul.f32 %v96_v1, %v25_v25  ;;  %v68_v38 = vadd.f32 %v97_v2, %v45_v30 }
   0x9   :  { %80 = vst [vmem:[%s223_s3 + $0x20] sm:$0xff] %v64_v27  ;;  %81 = vst [vmem:[%s223_s3 + $0x28] sm:$0xff] %v65_v28  ;;  %v49_v39 = vmul.f32 %v96_v1, %v26_v26  ;;  %v50_v40 = vmul.f32 %v96_v1, %v27_v31  ;;  %v51_v41 = vmul.f32 %v96_v1, %v28_v32 }
   0xa   :  { %82 = vst [vmem:[%s223_s3 + $0x30] sm:$0xff] %v66_v29  ;;  %83 = vst [vmem:[%s223_s3 + $0x38] sm:$0xff] %v67_v34  ;;  %v69_v42 = vadd.f32 %v97_v2, %v46_v35  ;;  %v70_v43 = vadd.f32 %v97_v2, %v47_v36  ;;  %v71_v44 = vadd.f32 %v97_v2, %v48_v37 }
   0xb   :  { %v52_v45 = vmul.f32 %v96_v1, %v29_v33  ;;  %84 = vst [vmem:[%s223_s3 + $0x40] sm:$0xff] %v68_v38  ;;  %v72_v46 = vadd.f32 %v97_v2, %v49_v39  ;;  %v73_v47 = vadd.f32 %v97_v2, %v50_v40  ;;  %v74_v48 = vadd.f32 %v97_v2, %v51_v41 }
   0xc   :  { %85 = vst [vmem:[%s223_s3 + $0x48] sm:$0xff] %v69_v42  ;;  %86 = vst [vmem:[%s223_s3 + $0x50] sm:$0xff] %v70_v43 }
   0xd   :  { %87 = vst [vmem:[%s223_s3 + $0x58] sm:$0xff] %v71_v44  ;;  %v75_v49 = vadd.f32 %v97_v2, %v52_v45  ;;  %88 = vst [vmem:[%s223_s3 + $0x60] sm:$0xff] %v72_v46 }
   0xe   :  { %89 = vst [vmem:[%s223_s3 + $0x68] sm:$0xff] %v73_v47  ;;  %90 = vst [vmem:[%s223_s3 + $0x70] sm:$0xff] %v74_v48 }
   0xf   :  { %91 = vst [vmem:[%s223_s3 + $0x78] sm:$0xff] %v75_v49 }

// kernel: basic_block_forward.9
= control target key start
LH: loop header
LB: loop body
LE: loop exit
PB: predicated region body
PF: predicated region fallthrough
CT: control target
= control target key end

     0   :  { %vm97_vm0 = vcmask 1041408   ;;  %vm72_vm1 = vcmask 31744   ;;  %s455_s1 = inlined_call_operand.vmem [shape: bf16[4,128], index: 1, kind: input, shape index: {}]   ;;  %s456_s0 = inlined_call_operand.vmem [shape: bf16[128,4], index: 0, kind: input, shape index: {}]   ;;  %s457_s2 = inlined_call_operand.vmem [shape: f32[128,128], index: 2, kind: output, shape index: {0}]   ;;  %s458_s3 = inlined_call_operand.vmem [shape: f32[1,8,128], index: 3, kind: output, shape index: {1}]   ;;  %s459_s4 = inlined_call_operand.vmem [shape: f32[1,8,128], index: 4, kind: output, shape index: {2}]  }
   0x1   :  { %v31_v0 = vld [vmem:[%s455_s1] sm:$0x3]  ;;  %v334_v3 = vld [vmem:[%s456_s0 + $0x8] sm:$0xff]   ;;  %v335_v4 = vld [vmem:[%s456_s0 + $0x10] sm:$0xff]  }
   0x2   :  { %331 = vmatprep.subr.msk.bf16.mxu0 %vm97_vm0, %v31_v0  ;;  %v99_v1 = vsel %vm97_vm0, %v31_v0, 0  ;;  %v333_v2 = vld [vmem:[%s456_s0] sm:$0xff]   ;;  %332 = vmatprep.subr.msk.bf16.mxu1 %vm97_vm0, %v31_v0  ;;  %v338_v6 = vld [vmem:[%s456_s0 + $0x28] sm:$0xff]   ;;  %v339_v7 = vld [vmem:[%s456_s0 + $0x30] sm:$0xff]  }
   0x3   :  { %312 = vmatpush3.bf16.msra.mxu0 %v99_v1  ;;  %330 = vmatpush3.bf16.msra.mxu1 %v99_v1  ;;  %v337_v5 = vld [vmem:[%s456_s0 + $0x20] sm:$0xff]   ;;  %v336_v8 = vld [vmem:[%s456_s0 + $0x18] sm:$0xff]  }
   0x4   :  { %313 = vmatprep.mubr.msk.bf16.mxu0 %vm72_vm1, %v333_v2  ;;  %321 = vmatprep.mubr.msk.bf16.mxu1 %vm72_vm1, %v337_v5  ;;  %v340_v9 = vld [vmem:[%s456_s0 + $0x38] sm:$0xff]  }
   0x6   :  { %314 = vmatmul.mubr.msk.bf16.vlgmr.msra.gmra.mrb[0].mxu0 %vm72_vm1, %v334_v3  ;;  %322 = vmatmul.mubr.msk.bf16.vlgmr.msra.gmra.mrb[0].mxu1 %vm72_vm1, %v338_v6 }
   0x7   :  { %317 = vmatprep.mubr.msk.bf16.mxu0 %vm72_vm1, %v335_v4  ;;  %325 = vmatprep.mubr.msk.bf16.mxu1 %vm72_vm1, %v339_v7 }
   0xe   :  { %318 = vmatmul.mubr.msk.bf16.gmra.mrb[4].mxu0 %vm72_vm1, %v336_v8  ;;  %326 = vmatmul.mubr.msk.bf16.gmra.mrb[4].mxu1 %vm72_vm1, %v340_v9 }
  0xd9   :  { %v315_v10 = vpop.f32.mrb[0].mxu0  ;;  %v323_v14 = vpop.f32.mrb[0].mxu1 }
  0xda   :  { %200 = vst [vmem:[%s457_s2 + $0x10] sm:$0xff] %v315_v10  ;;  %v135_v11 = vpop.f32.mrb[1].mxu0  ;;  %208 = vst [vmem:[%s457_s2 + $0x50] sm:$0xff] %v323_v14  ;;  %v167_v18 = vpop.f32.mrb[1].mxu1  ;;  %v237_v20 = vmul.f32 %v315_v10, %v315_v10  ;;  %v245_v53 = vmul.f32 %v323_v14, %v323_v14 }
  0xdb   :  { %198 = vst [vmem:[%s457_s2] sm:$0xff] %v135_v11  ;;  %v316_v12 = vpop.f32.mrb[2].mxu0  ;;  %v235_v15 = vmul.f32 %v135_v11, %v135_v11  ;;  %206 = vst [vmem:[%s457_s2 + $0x40] sm:$0xff] %v167_v18  ;;  %v324_v19 = vpop.f32.mrb[2].mxu1  ;;  %v243_v47 = vmul.f32 %v167_v18, %v167_v18 }
  0xdc   :  { %201 = vst [vmem:[%s457_s2 + $0x18] sm:$0xff] %v316_v12  ;;  %v138_v13 = vpop.f32.mrb[3].mxu0  ;;  %209 = vst [vmem:[%s457_s2 + $0x58] sm:$0xff] %v324_v19  ;;  %v170_v23 = vpop.f32.mrb[3].mxu1  ;;  %v238_v24 = vmul.f32 %v316_v12, %v316_v12  ;;  %v246_v56 = vmul.f32 %v324_v19, %v324_v19 }
  0xdd   :  { %199 = vst [vmem:[%s457_s2 + $0x8] sm:$0xff] %v138_v13  ;;  %v214_v16 = vadd.f32 %v138_v13, %v135_v11  ;;  %v236_v17 = vmul.f32 %v138_v13, %v138_v13  ;;  %207 = vst [vmem:[%s457_s2 + $0x48] sm:$0xff] %v170_v23  ;;  %v244_v52 = vmul.f32 %v170_v23, %v170_v23 }
  0xdf   :  { %v215_v21 = vadd.f32 %v315_v10, %v214_v16  ;;  %v251_v22 = vadd.f32 %v236_v17, %v235_v15 }
  0xe1   :  { %v252_v25 = vadd.f32 %v251_v22, %v237_v20  ;;  %v319_v26 = vpop.f32.mrb[4].mxu0  ;;  %v216_v27 = vadd.f32 %v316_v12, %v215_v21  ;;  %v327_v34 = vpop.f32.mrb[4].mxu1 }
  0xe2   :  { %204 = vst [vmem:[%s457_s2 + $0x30] sm:$0xff] %v319_v26  ;;  %v151_v28 = vpop.f32.mrb[5].mxu0  ;;  %212 = vst [vmem:[%s457_s2 + $0x70] sm:$0xff] %v327_v34  ;;  %v183_v38 = vpop.f32.mrb[5].mxu1  ;;  %v241_v40 = vmul.f32 %v319_v26, %v319_v26  ;;  %v249_v1 = vmul.f32 %v327_v34, %v327_v34 }
  0xe3   :  { %202 = vst [vmem:[%s457_s2 + $0x20] sm:$0xff] %v151_v28  ;;  %v217_v29 = vadd.f32 %v216_v27, %v151_v28  ;;  %v239_v30 = vmul.f32 %v151_v28, %v151_v28  ;;  %v253_v31 = vadd.f32 %v252_v25, %v238_v24  ;;  %v320_v32 = vpop.f32.mrb[6].mxu0  ;;  %210 = vst [vmem:[%s457_s2 + $0x60] sm:$0xff] %v183_v38  ;;  %v328_v39 = vpop.f32.mrb[6].mxu1 }
  0xe4   :  { %205 = vst [vmem:[%s457_s2 + $0x38] sm:$0xff] %v320_v32  ;;  %v154_v33 = vpop.f32.mrb[7].mxu0  ;;  %213 = vst [vmem:[%s457_s2 + $0x78] sm:$0xff] %v328_v39  ;;  %v186_v43 = vpop.f32.mrb[7].mxu1  ;;  %v242_v44 = vmul.f32 %v320_v32, %v320_v32  ;;  %v247_v59 = vmul.f32 %v183_v38, %v183_v38  ;;  %v250_v4 = vmul.f32 %v328_v39, %v328_v39 }
  0xe5   :  { %v254_v35 = vadd.f32 %v253_v31, %v239_v30  ;;  %203 = vst [vmem:[%s457_s2 + $0x28] sm:$0xff] %v154_v33  ;;  %v218_v36 = vadd.f32 %v217_v29, %v154_v33  ;;  %v240_v37 = vmul.f32 %v154_v33, %v154_v33  ;;  %211 = vst [vmem:[%s457_s2 + $0x68] sm:$0xff] %v186_v43 }
  0xe6   :  { %v248_v0 = vmul.f32 %v186_v43, %v186_v43 }
  0xe7   :  { %v219_v41 = vadd.f32 %v319_v26, %v218_v36  ;;  %v255_v42 = vadd.f32 %v254_v35, %v240_v37 }
  0xe9   :  { %v256_v45 = vadd.f32 %v255_v42, %v241_v40  ;;  %v220_v46 = vadd.f32 %v320_v32, %v219_v41 }
  0xeb   :  { %v221_v48 = vadd.f32 %v220_v46, %v167_v18  ;;  %v257_v49 = vadd.f32 %v256_v45, %v242_v44 }
  0xed   :  { %v258_v50 = vadd.f32 %v257_v49, %v243_v47  ;;  %v222_v51 = vadd.f32 %v221_v48, %v170_v23 }
  0xef   :  { %v223_v54 = vadd.f32 %v323_v14, %v222_v51  ;;  %v259_v55 = vadd.f32 %v258_v50, %v244_v52 }
  0xf1   :  { %v260_v57 = vadd.f32 %v259_v55, %v245_v53  ;;  %v224_v58 = vadd.f32 %v324_v19, %v223_v54 }
  0xf3   :  { %v225_v60 = vadd.f32 %v224_v58, %v183_v38  ;;  %v261_v61 = vadd.f32 %v260_v57, %v246_v56 }
  0xf5   :  { %v262_v62 = vadd.f32 %v261_v61, %v247_v59  ;;  %v226_v63 = vadd.f32 %v225_v60, %v186_v43 }
  0xf7   :  { %v227_v2 = vadd.f32 %v327_v34, %v226_v63  ;;  %v263_v3 = vadd.f32 %v262_v62, %v248_v0 }
  0xf9   :  { %v228_v5 = vadd.f32 %v328_v39, %v227_v2  ;;  %v264_v6 = vadd.f32 %v263_v3, %v249_v1 }
  0xfb   :  { %v229_v7 = vrot.slane %v228_v5, 4  ;;  %v265_v8 = vadd.f32 %v264_v6, %v250_v4 }
  0xfd   :  { %v230_v9 = vadd.f32 %v229_v7, %v228_v5  ;;  %v266_v10 = vrot.slane %v265_v8, 4 }
  0xff   :  { %v231_v11 = vrot.slane %v230_v9, 2  ;;  %v267_v12 = vadd.f32 %v266_v10, %v265_v8 }
 0x101   :  { %v232_v13 = vadd.f32 %v231_v11, %v230_v9  ;;  %v268_v14 = vrot.slane %v267_v12, 2 }
 0x103   :  { %v233_v15 = vrot.slane %v232_v13, 1  ;;  %v269_v16 = vadd.f32 %v268_v14, %v267_v12 }
 0x105   :  { %v234_v17 = vadd.f32 %v233_v15, %v232_v13  ;;  %v270_v18 = vrot.slane %v269_v16, 1 }
 0x107   :  { %v271_v19 = vadd.f32 %v270_v18, %v269_v16  ;;  %272 = vst [vmem:[%s458_s3] sm:$0xff] %v234_v17 }
 0x109   :  { %273 = vst [vmem:[%s459_s4] sm:$0xff] %v271_v19 }

// kernel: basic_block_forward.11
= control target key start
LH: loop header
LB: loop body
LE: loop exit
PB: predicated region body
PF: predicated region fallthrough
CT: control target
= control target key end

     0   :  { %s367_s0 = inlined_call_operand.vmem [shape: f32[128,128], index: 0, kind: input, shape index: {}]   ;;  %s368_s1 = inlined_call_operand.vmem [shape: f32[1,128], index: 1, kind: input, shape index: {}]   ;;  %s369_s2 = inlined_call_operand.vmem [shape: f32[1,128], index: 2, kind: input, shape index: {}]   ;;  %s370_s3 = inlined_call_operand.vmem [shape: f32[128,128], index: 3, kind: input, shape index: {}]   ;;  %s371_s4 = inlined_call_operand.hbm [shape: f32[128,128], index: 4, kind: output, shape index: {}]  }
   0x1   :  { %v18_v0 = vld [vmem:[%s367_s0] sm:$0xff]  ;;  %v19_v4 = vld [vmem:[%s367_s0 + $0x8] sm:$0xff]  ;;  %v20_v7 = vld [vmem:[%s367_s0 + $0x10] sm:$0xff] }
   0x2   :  { %v223_v1 = vld [vmem:[%s368_s1] ss:$0 sm:$0xff]  ;;  %v21_v8 = vld [vmem:[%s367_s0 + $0x18] sm:$0xff]  ;;  %v81_v10 = vld [vmem:[%s370_s3 + $0x8] sm:$0xff] }
   0x3   :  { %v228_v2 = vld [vmem:[%s369_s2] ss:$0 sm:$0xff]  ;;  %v41_v3 = vmul.f32 %v223_v1, %v18_v0  ;;  %v42_v6 = vmul.f32 %v223_v1, %v19_v4  ;;  %v43_v11 = vmul.f32 %v223_v1, %v20_v7  ;;  %v82_v12 = vld [vmem:[%s370_s3 + $0x10] sm:$0xff]  ;;  %v44_v13 = vmul.f32 %v223_v1, %v21_v8  ;;  %v83_v16 = vld [vmem:[%s370_s3 + $0x18] sm:$0xff] }
   0x4   :  { %v80_v5 = vld [vmem:[%s370_s3] sm:$0xff]  ;;  %v23_v18 = vld [vmem:[%s367_s0 + $0x28] sm:$0xff]  ;;  %v24_v19 = vld [vmem:[%s367_s0 + $0x30] sm:$0xff] }
   0x5   :  { %v64_v9 = vadd.f32 %v228_v2, %v41_v3  ;;  %v22_v14 = vld [vmem:[%s367_s0 + $0x20] sm:$0xff]  ;;  %v65_v15 = vadd.f32 %v228_v2, %v42_v6  ;;  %v66_v21 = vadd.f32 %v228_v2, %v43_v11  ;;  %v67_v22 = vadd.f32 %v228_v2, %v44_v13  ;;  %v25_v25 = vld [vmem:[%s367_s0 + $0x38] sm:$0xff]  ;;  %v85_v28 = vld [vmem:[%s370_s3 + $0x28] sm:$0xff] }
   0x6   :  { %v45_v17 = vmul.f32 %v223_v1, %v22_v14  ;;  %v84_v23 = vld [vmem:[%s370_s3 + $0x20] sm:$0xff]  ;;  %v46_v24 = vmul.f32 %v223_v1, %v23_v18  ;;  %v47_v29 = vmul.f32 %v223_v1, %v24_v19  ;;  %v48_v30 = vmul.f32 %v223_v1, %v25_v25  ;;  %v86_v36 = vld [vmem:[%s370_s3 + $0x30] sm:$0xff]  ;;  %v87_v37 = vld [vmem:[%s370_s3 + $0x38] sm:$0xff] }
   0x7   :  { %v96_v20 = vadd.f32 %v80_v5, %v64_v9  ;;  %v97_v26 = vadd.f32 %v81_v10, %v65_v15  ;;  %v26_v31 = vld [vmem:[%s367_s0 + $0x40] sm:$0xff]  ;;  %v98_v33 = vadd.f32 %v82_v12, %v66_v21  ;;  %v99_v34 = vadd.f32 %v83_v16, %v67_v22  ;;  %v27_v38 = vld [vmem:[%s367_s0 + $0x48] sm:$0xff]  ;;  %v28_v43 = vld [vmem:[%s367_s0 + $0x50] sm:$0xff] }
   0x8   :  { %v68_v27 = vadd.f32 %v228_v2, %v45_v17  ;;  %v69_v35 = vadd.f32 %v228_v2, %v46_v24  ;;  %v70_v41 = vadd.f32 %v228_v2, %v47_v29  ;;  %v71_v42 = vadd.f32 %v228_v2, %v48_v30  ;;  %v29_v44 = vld [vmem:[%s367_s0 + $0x58] sm:$0xff]  ;;  %v30_v49 = vld [vmem:[%s367_s0 + $0x60] sm:$0xff]  ;;  %v89_v55 = vld [vmem:[%s370_s3 + $0x48] sm:$0xff] }
   0x9   :  { %v112_v32 = vmax.f32 %v96_v20, 0.0  ;;  %v113_v39 = vmax.f32 %v97_v26, 0.0  ;;  %v114_v45 = vmax.f32 %v98_v33, 0.0  ;;  %v115_v46 = vmax.f32 %v99_v34, 0.0  ;;  %v88_v53 = vld [vmem:[%s370_s3 + $0x40] sm:$0xff]  ;;  %v31_v56 = vld [vmem:[%s367_s0 + $0x68] sm:$0xff] }
   0xa   :  { %v100_v40 = vadd.f32 %v84_v23, %v68_v27  ;;  %v101_v47 = vadd.f32 %v85_v28, %v69_v35  ;;  %v49_v48 = vmul.f32 %v223_v1, %v26_v31  ;;  %v102_v51 = vadd.f32 %v86_v36, %v70_v41  ;;  %v32_v61 = vld [vmem:[%s367_s0 + $0x70] sm:$0xff]  ;;  %v33_v62 = vld [vmem:[%s367_s0 + $0x78] sm:$0xff] }
   0xb   :  { %128 = vst [vmem:[#allocation2] sm:$0xff] %v112_v32  ;;  %129 = vst [vmem:[#allocation2 + $0x8] sm:$0xff] %v113_v39  ;;  %v103_v52 = vadd.f32 %v87_v37, %v71_v42  ;;  %v50_v54 = vmul.f32 %v223_v1, %v27_v38  ;;  %v51_v59 = vmul.f32 %v223_v1, %v28_v43 }
   0xc   :  { %v116_v50 = vmax.f32 %v100_v40, 0.0  ;;  %130 = vst [vmem:[#allocation2 + $0x10] sm:$0xff] %v114_v45  ;;  %131 = vst [vmem:[#allocation2 + $0x18] sm:$0xff] %v115_v46  ;;  %v117_v57 = vmax.f32 %v101_v47, 0.0  ;;  %v72_v58 = vadd.f32 %v228_v2, %v49_v48  ;;  %v52_v60 = vmul.f32 %v223_v1, %v29_v44 }
   0xd   :  { %9 = vsyncpa [#allocation3], 0  ;;  %v118_v63 = vmax.f32 %v102_v51, 0.0  ;;  %v119_v0 = vmax.f32 %v103_v52, 0.0  ;;  %v73_v3 = vadd.f32 %v228_v2, %v50_v54  ;;  %v90_v4 = vld [vmem:[%s370_s3 + $0x50] sm:$0xff]  ;;  %v91_v5 = vld [vmem:[%s370_s3 + $0x58] sm:$0xff]  ;;  %v53_v6 = vmul.f32 %v223_v1, %v30_v49 }
   0xe   :  { %132 = vst [vmem:[#allocation2 + $0x20] sm:$0xff] %v116_v50  ;;  %133 = vst [vmem:[#allocation2 + $0x28] sm:$0xff] %v117_v57  ;;  %v104_v7 = vadd.f32 %v88_v53, %v72_v58  ;;  %v74_v8 = vadd.f32 %v228_v2, %v51_v59  ;;  %v75_v9 = vadd.f32 %v228_v2, %v52_v60  ;;  %v92_v10 = vld [vmem:[%s370_s3 + $0x60] sm:$0xff]  ;;  %v93_v14 = vld [vmem:[%s370_s3 + $0x68] sm:$0xff]  ;;  %s189_s1 = smov [#allocation2]  }
   0xf   :  { %v54_v11 = vmul.f32 %v223_v1, %v31_v56  ;;  %134 = vst [vmem:[#allocation2 + $0x30] sm:$0xff] %v118_v63  ;;  %135 = vst [vmem:[#allocation2 + $0x38] sm:$0xff] %v119_v0  ;;  %v105_v12 = vadd.f32 %v89_v55, %v73_v3  ;;  %v76_v13 = vadd.f32 %v228_v2, %v53_v6  ;;  %v94_v21 = vld [vmem:[%s370_s3 + $0x70] sm:$0xff]  ;;  %v95_v22 = vld [vmem:[%s370_s3 + $0x78] sm:$0xff]  ;;  %s149_s26 = sshll.u32 %s189_s1, 4  ;;  %s150_s26 = int_to_ptr.vmem [resolvable:$true] %s149_s26 }
  0x10   :  { %v55_v15 = vmul.f32 %v223_v1, %v32_v61  ;;  %v56_v16 = vmul.f32 %v223_v1, %v33_v62  ;;  %v120_v17 = vmax.f32 %v104_v7, 0.0  ;;  %v106_v18 = vadd.f32 %v90_v4, %v74_v8  ;;  %s165_s3 = scalar_lea.vmem %s150_s26, 2048  ;;  %p170_p1 = scmp.lt.s32.totalorder %s150_s26, %s150_s26 }
  0x11   :  { %v107_v19 = vadd.f32 %v91_v5, %v75_v9  ;;  %v77_v20 = vadd.f32 %v228_v2, %v54_v11  ;;  %v121_v23 = vmax.f32 %v105_v12, 0.0  ;;  %v108_v24 = vadd.f32 %v92_v10, %v76_v13  ;;  %p166_p0 = scmp.ne.s32.totalorder %s150_s26, %s165_s3  ;;  %p171_p2 = scmp.lt.s32.totalorder %s165_s3, %s165_s3 }
  0x12   :  { %v78_v25 = vadd.f32 %v228_v2, %v55_v15  ;;  %v79_v26 = vadd.f32 %v228_v2, %v56_v16  ;;  %136 = vst [vmem:[#allocation2 + $0x40] sm:$0xff] %v120_v17  ;;  %v122_v1 = vmax.f32 %v106_v18, 0.0 }
  0x13   :  { %v123_v27 = vmax.f32 %v107_v19, 0.0  ;;  %v109_v28 = vadd.f32 %v93_v14, %v77_v20  ;;  %137 = vst [vmem:[#allocation2 + $0x48] sm:$0xff] %v121_v23  ;;  %v124_v29 = vmax.f32 %v108_v24, 0.0  ;;  %p172_p3 = por %p171_p2, %p170_p1 }
  0x14   :  { %v110_v30 = vadd.f32 %v94_v21, %v78_v25  ;;  %v111_v31 = vadd.f32 %v95_v22, %v79_v26  ;;  %138 = vst [vmem:[#allocation2 + $0x50] sm:$0xff] %v122_v1 }
  0x15   :  { %139 = vst [vmem:[#allocation2 + $0x58] sm:$0xff] %v123_v27  ;;  %v125_v32 = vmax.f32 %v109_v28, 0.0  ;;  %140 = vst [vmem:[#allocation2 + $0x60] sm:$0xff] %v124_v29  ;;  %p173_p4 = pnand %p172_p3, %p166_p0 }
  0x16   :  { %v126_v33 = vmax.f32 %v110_v30, 0.0  ;;  %v127_v34 = vmax.f32 %v111_v31, 0.0 }
  0x17   :  { %141 = vst [vmem:[#allocation2 + $0x68] sm:$0xff] %v125_v32 }
  0x18   :  { %142 = vst [vmem:[#allocation2 + $0x70] sm:$0xff] %v126_v33  ;;  %143 = vst [vmem:[#allocation2 + $0x78] sm:$0xff] %v127_v34 }
  0x19   :  { %176 = shalt.err (!%p173_p4)
}
  0x1a   :  { %s177_s28 = scalar_lea.hbm %s371_s4, 2048 }
  0x1b   :  { %p178_p5 = scmp.ne.s32.totalorder %s371_s4, %s177_s28  ;;  %p181_p6 = scmp.lt.u32.totalorder %s177_s28, %s371_s4 }
  0x1d   :  { %p183_p7 = pnand %p181_p6, %p178_p5 }
  0x1f   :  { %186 = shalt.err (!%p183_p7)
}
  0x20   :  { %s190_s7 = smov 128   ;;  %s191_s8 = smov 8  }
  0x21   :  { %155 = dma.vmem_to_hbm [thread:$0]  %s150_s26, 2048, %s371_s4, [#allocation3], %s190_s7, %s190_s7, %s191_s8  }
  0x22   :  { %187 = dma.done.wait [#allocation3], 2048  }
  0x23   :  { %188 = vsyncadd [#allocation3], 4294965248 }
  0x24   :  { %159 = vsyncpa [#allocation3], 1 }

</bundles_post_ra>
